<compile_context>
chip_gen: v7x
topology: tpu7x:2x2x1
jax: 0.10.0
libtpu: 0.0.40
codegen_flags: <defaults>
</compile_context>

<pallas_src>
import math

import jax
import jax.numpy as jnp
from jax.experimental import pallas as pl
from jax.experimental.pallas import tpu as pltpu


H_IN = 16             # image height == conv kernel height
W_OUT = 360           # image width == conv output width == final logits width
W_PAD = W_OUT + 2     # circularly padded width
KW = 3                # conv kernel width
FC1_OUT = 2 * W_OUT   # 720


def _round_up(a, b):
    return (a + b - 1) // b * b


# ----------------------------------------------------------------------------
# Fused Pallas kernel: conv + ReLU + fc1 + ReLU + fc2 + sigmoid
# ----------------------------------------------------------------------------

def _fused_forward_kernel(xp_ref, wc_ref, bc_ref, w1_ref, b1_ref, w2_ref,
                          b2_ref, out_ref):
    """One batch tile of the full gallery_detector_v2 forward.

    xp_ref : (TM, 16, 362) f32   circularly W-padded input tile
    wc_ref : (3, 16, 360)  f32   conv weight, pre-broadcast along W
                                  wc[kw, kh, :] == torch_w[0, 0, kh, kw]
    bc_ref : (1, 1)        f32   conv bias (SMEM scalar)
    w1_ref : (360, 720)    bf16  fc1 weight, stored (in, out)
    b1_ref : (1, 720)      f32   fc1 bias
    w2_ref : (720, 360)    bf16  fc2 weight, stored (in, out)
    b2_ref : (1, 360)      f32   fc2 bias
    out_ref: (TM, 360)     f32
    """
    # --- Conv2d(1, 1, [16, 3], circular W pad) + ReLU ------------------------
    # Accumulate the 3 kw taps on the (TM, 16, 360) slab (pure VPU madds),
    # then do a SINGLE cross-sublane (XLU) reduce over kh.
    s = xp_ref[:, :, pl.ds(0, W_OUT)] * wc_ref[0]
    s = s + xp_ref[:, :, pl.ds(1, W_OUT)] * wc_ref[1]
    s = s + xp_ref[:, :, pl.ds(2, W_OUT)] * wc_ref[2]
    h0 = jnp.maximum(jnp.sum(s, axis=1) + bc_ref[0, 0], 0.0)   # (TM, 360)

    # --- Flatten -> Linear(360, 720) -> ReLU (bf16 MXU, f32 acc) -------------
    h1 = jnp.dot(h0.astype(jnp.bfloat16), w1_ref[...],
                 preferred_element_type=jnp.float32)
    h1 = jnp.maximum(h1 + b1_ref[...], 0.0)                     # (TM, 720)

    # --- Linear(720, 360) -> Sigmoid (bf16 MXU + EUP exp/rcp) ----------------
    h2 = jnp.dot(h1.astype(jnp.bfloat16), w2_ref[...],
                 preferred_element_type=jnp.float32)
    h2 = h2 + b2_ref[...]                                       # (TM, 360)
    out_ref[...] = pl.reciprocal(1.0 + jnp.exp(-h2), approx=True)


# ----------------------------------------------------------------------------
# Wrapper
# ----------------------------------------------------------------------------

def gallery_detector_v2_forward(params, x_nchw, *, batch_tile=128):
    """x_nchw: (N, 1, 16, 360) float32 (PyTorch layout)."""
    x = x_nchw.astype(jnp.float32)
    n = x.shape[0]
    assert x.shape[1:] == (1, H_IN, W_OUT), x.shape
    x = x[:, 0]                                               # (N, 16, 360)

    wc, bc = params["conv"]          # (3, 16), (1,)
    w1, b1 = params["fc1"]           # (360, 720), (720,)
    w2, b2 = params["fc2"]           # (720, 360), (360,)

    # Batch tiling: full 128-row MXU tiles for real batches, one small
    # multiple-of-8 tile for tiny batches.  VMEM footprint stays ~3-7 MB.
    tm = min(batch_tile, _round_up(n, 8))
    n_pad = _round_up(n, tm)
    if n_pad != n:
        x = jnp.pad(x, ((0, n_pad - n), (0, 0), (0, 0)))

    # PyTorch padding=(0, 1) with padding_mode='circular': wrap W by 1.
    xp = jnp.pad(x, ((0, 0), (0, 0), (1, 1)), mode="wrap")    # (n_pad, 16, 362)

    # Weight prep (cheap layout plumbing):
    #  * conv weight pre-broadcast along W -> no in-kernel lane broadcasts,
    #  * fc weights in bf16 -> halves weight HBM bytes, bf16-native MXU.
    wcb = jnp.broadcast_to(wc[:, :, None], (KW, H_IN, W_OUT)).astype(jnp.float32)
    w1b = w1.astype(jnp.bfloat16)
    w2b = w2.astype(jnp.bfloat16)

    const2 = lambda i: (0, 0)
    const3 = lambda i: (0, 0, 0)

    out = pl.pallas_call(
        _fused_forward_kernel,
        out_shape=jax.ShapeDtypeStruct((n_pad, W_OUT), jnp.float32),
        grid_spec=pltpu.PrefetchScalarGridSpec(
            num_scalar_prefetch=0,
            grid=(n_pad // tm,),
            in_specs=[
                # Only the input tile moves with the grid.
                pl.BlockSpec((tm, H_IN, W_PAD), lambda i: (i, 0, 0)),
                # Weights / biases: constant index maps -> fetched once and
                # VMEM-resident across all batch tiles.
                pl.BlockSpec((KW, H_IN, W_OUT), const3),
                pl.BlockSpec(memory_space=pltpu.MemorySpace.SMEM),
                pl.BlockSpec((W_OUT, FC1_OUT), const2),
                pl.BlockSpec((1, FC1_OUT), const2),
                pl.BlockSpec((FC1_OUT, W_OUT), const2),
                pl.BlockSpec((1, W_OUT), const2),
            ],
            out_specs=pl.BlockSpec((tm, W_OUT), lambda i: (i, 0)),
        ),
        compiler_params=pltpu.CompilerParams(
            # Batch tiles are independent -> shard across TCs (2 on v7x).
            dimension_semantics=("parallel",)),
    )(xp, wcb, bc.reshape(1, 1), w1b, b1.reshape(1, -1), w2b, b2.reshape(1, -1))
    return out[:n]


# ----------------------------------------------------------------------------
# Pure-JAX reference (f32 everywhere) for a correctness check
# ----------------------------------------------------------------------------

def reference_forward(params, x_nchw):
    x = x_nchw.astype(jnp.float32)[:, 0]                      # (N, 16, 360)
    xp = jnp.pad(x, ((0, 0), (0, 0), (1, 1)), mode="wrap")    # (N, 16, 362)
    wc, bc = params["conv"]
    conv = sum(
        jnp.einsum("nhw,h->nw", xp[:, :, kw:kw + W_OUT], wc[kw])
        for kw in range(KW)
    ) + bc[0]
    h0 = jnp.maximum(conv, 0.0)
    w1, b1 = params["fc1"]
    w2, b2 = params["fc2"]
    h1 = jnp.maximum(h0 @ w1 + b1, 0.0)
    h2 = h1 @ w2 + b2
    return jax.nn.sigmoid(h2)


# ----------------------------------------------------------------------------
# Parameters (deterministic, PyTorch-default-style uniform init, f32)
# ----------------------------------------------------------------------------

def init_params(seed=0):
    keys = jax.random.split(jax.random.PRNGKey(seed), 6)
    # Conv2d(1, 1, [16, 3]): fan_in = 1 * 16 * 3
    cb = 1.0 / math.sqrt(H_IN * KW)
    wc = jax.random.uniform(keys[0], (KW, H_IN), jnp.float32, -cb, cb)
    bc = jax.random.uniform(keys[1], (1,), jnp.float32, -cb, cb)
    # Linear(360, 720) — stored transposed as (in, out)
    b1b = 1.0 / math.sqrt(float(W_OUT))
    w1 = jax.random.uniform(keys[2], (W_OUT, FC1_OUT), jnp.float32, -b1b, b1b)
    b1 = jax.random.uniform(keys[3], (FC1_OUT,), jnp.float32, -b1b, b1b)
    # Linear(720, 360)
    b2b = 1.0 / math.sqrt(float(FC1_OUT))
    w2 = jax.random.uniform(keys[4], (FC1_OUT, W_OUT), jnp.float32, -b2b, b2b)
    b2 = jax.random.uniform(keys[5], (W_OUT,), jnp.float32, -b2b, b2b)
    return {"conv": (wc, bc), "fc1": (w1, b1), "fc2": (w2, b2)}


# ----------------------------------------------------------------------------
# Main
# ----------------------------------------------------------------------------

if __name__ == "__main__":
    # Input geometry fixed by the module: (N, 1, 16, 360); batch = 2.
    x = jax.random.normal(jax.random.PRNGKey(0), (2, 1, H_IN, W_OUT),
                          dtype=jnp.float32)
    params = init_params(seed=0)

    fwd = jax.jit(gallery_detector_v2_forward)
    out = jax.block_until_ready(fwd(params, x))

    assert out.shape == (2, W_OUT), out.shape
    assert bool(jnp.all(jnp.isfinite(out)))
    assert bool(jnp.all((out >= 0.0) & (out <= 1.0)))          # sigmoid range

    ref = jax.block_until_ready(jax.jit(reference_forward)(params, x))
    max_err = float(jnp.max(jnp.abs(out - ref)))
    assert max_err < 1e-2, f"max |pallas - reference| = {max_err}"

    print("KERNEL_OK")
</pallas_src>

<mosaic_0001>
module attributes {stable_mosaic.version = 11 : i64} {
  func.func @_fused_forward_kernel(%arg0: i32, %arg1: memref<8x16x362xf32, #tpu.memory_space<vmem>>, %arg2: memref<3x16x360xf32, #tpu.memory_space<vmem>>, %arg3: memref<1x1xf32, #tpu.memory_space<smem>>, %arg4: memref<360x720xbf16, #tpu.memory_space<vmem>>, %arg5: memref<1x720xf32, #tpu.memory_space<vmem>>, %arg6: memref<720x360xbf16, #tpu.memory_space<vmem>>, %arg7: memref<1x360xf32, #tpu.memory_space<vmem>>, %arg8: memref<8x360xf32, #tpu.memory_space<vmem>>) attributes {dimension_semantics = [#tpu.dimension_semantics<parallel>], iteration_bounds = array<i64: 1>, scalar_prefetch = 0 : i64, scratch_operands = 0 : i64, tpu.core_type = #tpu.core_type<tc>, window_params = [{transform_indices = @transform_0, window_bounds = array<i64: 8, 16, 362>}, {pipeline_mode = #tpu.pipeline_mode<synchronous>, transform_indices = @transform_1, window_bounds = array<i64: 3, 16, 360>}, {transform_indices = @transform_2, window_bounds = array<i64: 1, 1>}, {pipeline_mode = #tpu.pipeline_mode<synchronous>, transform_indices = @transform_3, window_bounds = array<i64: 360, 720>}, {pipeline_mode = #tpu.pipeline_mode<synchronous>, transform_indices = @transform_4, window_bounds = array<i64: 1, 720>}, {pipeline_mode = #tpu.pipeline_mode<synchronous>, transform_indices = @transform_5, window_bounds = array<i64: 720, 360>}, {pipeline_mode = #tpu.pipeline_mode<synchronous>, transform_indices = @transform_6, window_bounds = array<i64: 1, 360>}, {transform_indices = @transform_7, window_bounds = array<i64: 8, 360>}]} {
    %c0 = arith.constant 0 : index
    %c0_0 = arith.constant 0 : index
    %c0_1 = arith.constant 0 : index
    %0 = vector.load %arg1[%c0, %c0_0, %c0_1] : memref<8x16x362xf32, #tpu.memory_space<vmem>>, vector<8x16x360xf32>
    %c0_2 = arith.constant 0 : index
    %c0_3 = arith.constant 0 : index
    %c0_4 = arith.constant 0 : index
    %1 = vector.load %arg2[%c0_2, %c0_3, %c0_4] : memref<3x16x360xf32, #tpu.memory_space<vmem>>, vector<1x16x360xf32>
    %2 = vector.shape_cast %1 : vector<1x16x360xf32> to vector<16x360xf32>
    %3 = vector.shape_cast %2 : vector<16x360xf32> to vector<1x16x360xf32>
    %4 = vector.broadcast %3 : vector<1x16x360xf32> to vector<8x16x360xf32>
    %5 = arith.mulf %0, %4 : vector<8x16x360xf32>
    %c0_5 = arith.constant 0 : index
    %c0_6 = arith.constant 0 : index
    %c1 = arith.constant 1 : index
    %6 = vector.load %arg1[%c0_5, %c0_6, %c1] : memref<8x16x362xf32, #tpu.memory_space<vmem>>, vector<8x16x360xf32>
    %c1_7 = arith.constant 1 : index
    %c0_8 = arith.constant 0 : index
    %c0_9 = arith.constant 0 : index
    %7 = vector.load %arg2[%c1_7, %c0_8, %c0_9] : memref<3x16x360xf32, #tpu.memory_space<vmem>>, vector<1x16x360xf32>
    %8 = vector.shape_cast %7 : vector<1x16x360xf32> to vector<16x360xf32>
    %9 = vector.shape_cast %8 : vector<16x360xf32> to vector<1x16x360xf32>
    %10 = vector.broadcast %9 : vector<1x16x360xf32> to vector<8x16x360xf32>
    %11 = arith.mulf %6, %10 : vector<8x16x360xf32>
    %12 = arith.addf %5, %11 : vector<8x16x360xf32>
    %c0_10 = arith.constant 0 : index
    %c0_11 = arith.constant 0 : index
    %c2 = arith.constant 2 : index
    %13 = vector.load %arg1[%c0_10, %c0_11, %c2] : memref<8x16x362xf32, #tpu.memory_space<vmem>>, vector<8x16x360xf32>
    %c2_12 = arith.constant 2 : index
    %c0_13 = arith.constant 0 : index
    %c0_14 = arith.constant 0 : index
    %14 = vector.load %arg2[%c2_12, %c0_13, %c0_14] : memref<3x16x360xf32, #tpu.memory_space<vmem>>, vector<1x16x360xf32>
    %15 = vector.shape_cast %14 : vector<1x16x360xf32> to vector<16x360xf32>
    %16 = vector.shape_cast %15 : vector<16x360xf32> to vector<1x16x360xf32>
    %17 = vector.broadcast %16 : vector<1x16x360xf32> to vector<8x16x360xf32>
    %18 = arith.mulf %13, %17 : vector<8x16x360xf32>
    %19 = arith.addf %12, %18 : vector<8x16x360xf32>
    %cst = arith.constant dense<0.000000e+00> : vector<8x360xf32>
    %20 = vector.multi_reduction <add>, %19, %cst [1] : vector<8x16x360xf32> to vector<8x360xf32>
    %c0_15 = arith.constant 0 : index
    %c0_16 = arith.constant 0 : index
    %21 = memref.load %arg3[%c0_15, %c0_16] : memref<1x1xf32, #tpu.memory_space<smem>>
    %22 = vector.broadcast %21 : f32 to vector<8x360xf32>
    %23 = arith.addf %20, %22 : vector<8x360xf32>
    %cst_17 = arith.constant 0.000000e+00 : f32
    %24 = vector.broadcast %cst_17 : f32 to vector<8x360xf32>
    %25 = arith.maximumf %23, %24 : vector<8x360xf32>
    %26 = arith.truncf %25 : vector<8x360xf32> to vector<8x360xbf16>
    %c0_18 = arith.constant 0 : index
    %c0_19 = arith.constant 0 : index
    %27 = vector.load %arg4[%c0_18, %c0_19] : memref<360x720xbf16, #tpu.memory_space<vmem>>, vector<360x720xbf16>
    %cst_20 = arith.constant dense<0.000000e+00> : vector<8x720xf32>
    %28 = tpu.matmul %26, %27, %cst_20 {dimension_numbers = #tpu.dot_dimension_numbers<[1], [0], [0], [1], [0, 0, 1, 1], [], []>} : vector<8x360xbf16>, vector<360x720xbf16>, vector<8x720xf32> -> vector<8x720xf32>
    %c0_21 = arith.constant 0 : index
    %c0_22 = arith.constant 0 : index
    %29 = vector.load %arg5[%c0_21, %c0_22] : memref<1x720xf32, #tpu.memory_space<vmem>>, vector<1x720xf32>
    %30 = vector.broadcast %29 : vector<1x720xf32> to vector<8x720xf32>
    %31 = arith.addf %28, %30 : vector<8x720xf32>
    %cst_23 = arith.constant 0.000000e+00 : f32
    %32 = vector.broadcast %cst_23 : f32 to vector<8x720xf32>
    %33 = arith.maximumf %31, %32 : vector<8x720xf32>
    %34 = arith.truncf %33 : vector<8x720xf32> to vector<8x720xbf16>
    %c0_24 = arith.constant 0 : index
    %c0_25 = arith.constant 0 : index
    %35 = vector.load %arg6[%c0_24, %c0_25] : memref<720x360xbf16, #tpu.memory_space<vmem>>, vector<720x360xbf16>
    %cst_26 = arith.constant dense<0.000000e+00> : vector<8x360xf32>
    %36 = tpu.matmul %34, %35, %cst_26 {dimension_numbers = #tpu.dot_dimension_numbers<[1], [0], [0], [1], [0, 0, 1, 1], [], []>} : vector<8x720xbf16>, vector<720x360xbf16>, vector<8x360xf32> -> vector<8x360xf32>
    %c0_27 = arith.constant 0 : index
    %c0_28 = arith.constant 0 : index
    %37 = vector.load %arg7[%c0_27, %c0_28] : memref<1x360xf32, #tpu.memory_space<vmem>>, vector<1x360xf32>
    %38 = vector.broadcast %37 : vector<1x360xf32> to vector<8x360xf32>
    %39 = arith.addf %36, %38 : vector<8x360xf32>
    %cst_29 = arith.constant 0.000000e+00 : f32
    %40 = vector.broadcast %cst_29 : f32 to vector<8x360xf32>
    %41 = arith.subf %40, %39 : vector<8x360xf32>
    %42 = math.exp %41 : vector<8x360xf32>
    %cst_30 = arith.constant 1.000000e+00 : f32
    %43 = vector.broadcast %cst_30 : f32 to vector<8x360xf32>
    %44 = arith.addf %43, %42 : vector<8x360xf32>
    %45 = tpu.reciprocal %44 {approx = true} : vector<8x360xf32> -> vector<8x360xf32>
    %c0_31 = arith.constant 0 : index
    %c0_32 = arith.constant 0 : index
    %46 = vector.load %arg8[%c0_31, %c0_32] : memref<8x360xf32, #tpu.memory_space<vmem>>, vector<8x360xf32>
    tpu.vector_store %arg8[%c0_31, %c0_32], %45 {strides = array<i32>} : memref<8x360xf32, #tpu.memory_space<vmem>>, vector<8x360xf32>,
    return
  }
  func.func @transform_0(%arg0: i32) -> (i32, i32, i32) {
    %c0_i32 = arith.constant 0 : i32
    %c0_i32_0 = arith.constant 0 : i32
    %c0_i32_1 = arith.constant 0 : i32
    return %arg0, %c0_i32, %c0_i32_0 : i32, i32, i32
  }
  func.func @transform_1(%arg0: i32) -> (i32, i32, i32) {
    %c0_i32 = arith.constant 0 : i32
    %c0_i32_0 = arith.constant 0 : i32
    %c0_i32_1 = arith.constant 0 : i32
    %c0_i32_2 = arith.constant 0 : i32
    return %c0_i32, %c0_i32_0, %c0_i32_1 : i32, i32, i32
  }
  func.func @transform_2(%arg0: i32) -> (i32, i32) {
    %c0_i32 = arith.constant 0 : i32
    %c0_i32_0 = arith.constant 0 : i32
    %c0_i32_1 = arith.constant 0 : i32
    return %c0_i32, %c0_i32_0 : i32, i32
  }
  func.func @transform_3(%arg0: i32) -> (i32, i32) {
    %c0_i32 = arith.constant 0 : i32
    %c0_i32_0 = arith.constant 0 : i32
    %c0_i32_1 = arith.constant 0 : i32
    return %c0_i32, %c0_i32_0 : i32, i32
  }
  func.func @transform_4(%arg0: i32) -> (i32, i32) {
    %c0_i32 = arith.constant 0 : i32
    %c0_i32_0 = arith.constant 0 : i32
    %c0_i32_1 = arith.constant 0 : i32
    return %c0_i32, %c0_i32_0 : i32, i32
  }
  func.func @transform_5(%arg0: i32) -> (i32, i32) {
    %c0_i32 = arith.constant 0 : i32
    %c0_i32_0 = arith.constant 0 : i32
    %c0_i32_1 = arith.constant 0 : i32
    return %c0_i32, %c0_i32_0 : i32, i32
  }
  func.func @transform_6(%arg0: i32) -> (i32, i32) {
    %c0_i32 = arith.constant 0 : i32
    %c0_i32_0 = arith.constant 0 : i32
    %c0_i32_1 = arith.constant 0 : i32
    return %c0_i32, %c0_i32_0 : i32, i32
  }
  func.func @transform_7(%arg0: i32) -> (i32, i32) {
    %c0_i32 = arith.constant 0 : i32
    %c0_i32_0 = arith.constant 0 : i32
    return %arg0, %c0_i32 : i32, i32
  }
}

</mosaic_0001>

<bundles_post_ra>
// kernel: gallery_detector_v2_forward.1
= control target key start
LH: loop header
LB: loop body
LE: loop exit
PB: predicated region body
PF: predicated region fallthrough
CT: control target
= control target key end

     0   :  { %s4288_s28 = smov 1   ;;  %s4289_s18 = smov 2   ;;  %vm155_vm0 = vcmask 7168   ;;  %vm512_vm1 = vcmask 15360   ;;  %vm358_vm2 = vcmask 1039360   ;;  %vm715_vm3 = vcmask 1031168   ;;  %s6461_s1 = inlined_call_operand.vmem [shape: f32[3,16,360], index: 1, kind: input, shape index: {}]   ;;  %s6462_s0 = inlined_call_operand.vmem [shape: f32[8,16,362], index: 0, kind: input, shape index: {}]   ;;  %s6463_s3 = inlined_call_operand.vmem [shape: bf16[360,720], index: 3, kind: input, shape index: {}]   ;;  %s6464_s2 = inlined_call_operand.<no memory space> [shape: f32[1,1], index: 2, kind: input, shape index: {}]   ;;  %s6465_s5 = inlined_call_operand.vmem [shape: bf16[720,360], index: 5, kind: input, shape index: {}]   ;;  %s6466_s4 = inlined_call_operand.vmem [shape: f32[1,720], index: 4, kind: input, shape index: {}]   ;;  %s6467_s6 = inlined_call_operand.vmem [shape: f32[1,360], index: 6, kind: input, shape index: {}]   ;;  %s6468_s7 = inlined_call_operand.vmem [shape: f32[8,360], index: 7, kind: output, shape index: {}]  }
   0x1   :  { %v3494_v0 = vld [vmem:[%s6461_s1 + $0x40] sm:$0xff]  ;;  %v3492_v1 = vld [vmem:[%s6461_s1 + $0x30] sm:$0xff]  ;;  %v3495_v2 = vld [vmem:[%s6461_s1 + $0x48] sm:$0xff]  ;;  %s4290_s10 = smov 127   ;;  %s4291_s21 = smov 126   ;;  %vm858_vm4 = vcmask 850944  }
   0x2   :  { %147 = vrot.lane.b32.xlu1 %v3494_v0, %s4288_s28  ;;  %143 = vrot.lane.b32.xlu0 %v3492_v1, %s4288_s28  ;;  %v3493_v3 = vld [vmem:[%s6461_s1 + $0x38] sm:$0xff]  ;;  %v3496_v4 = vld [vmem:[%s6461_s1 + $0x50] sm:$0xff]  ;;  %vm1318_vm5 = vcmask 1041409   ;;  %vm1320_vm6 = vcmask 1042434   ;;  %vm1322_vm7 = vcmask 1043459   ;;  %vm1324_vm8 = vcmask 1044484  }
   0x3   :  { %v3497_v5 = vld [vmem:[%s6461_s1 + $0x58] sm:$0xff]  ;;  %v3498_v6 = vld [vmem:[%s6461_s1 + $0x60] sm:$0xff]  ;;  %v3499_v7 = vld [vmem:[%s6461_s1 + $0x68] sm:$0xff]  ;;  %vm1326_vm9 = vcmask 1045509   ;;  %vm1328_vm10 = vcmask 1046534   ;;  %vm1330_vm11 = vcmask 1047559  }
   0x4   :  { %v3500_v8 = vld [vmem:[%s6461_s1 + $0x70] sm:$0xff]  ;;  %v3501_v9 = vld [vmem:[%s6461_s1 + $0x78] sm:$0xff]  ;;  %v3502_v10 = vld [vmem:[%s6461_s1 + $0x80] sm:$0xff]  ;;  %vm2029_vm12 = vcmask 1043456   ;;  %vm3223_vm13 = vcmask 654336  }
   0x5   :  { %v3503_v11 = vld [vmem:[%s6461_s1 + $0x88] sm:$0xff]  ;;  %v4372_v12 = vld [vmem:[%s6462_s0] sm:$0xff]  ;;  %v4379_v15 = vld [vmem:[%s6462_s0 + $0x30] sm:$0xff] }
   0x6   :  { %149 = vrot.lane.b32.xlu1 %v3495_v2, %s4288_s28  ;;  %145 = vrot.lane.b32.xlu0 %v3493_v3, %s4288_s28  ;;  %v4386_v17 = vld [vmem:[%s6462_s0 + $0x18] sm:$0xff]  ;;  %v4398_v22 = vld [vmem:[%s6462_s0 + $0x48] sm:$0xff] }
   0x7   :  { %v4403_v23 = vld [vmem:[%s6462_s0 + $0x60] sm:$0xff]  ;;  %v4414_v28 = vld [vmem:[%s6462_s0 + $0x78] sm:$0xff]  ;;  %v4419_v29 = vld [vmem:[%s6462_s0 + $0x90] sm:$0xff] }
   0x8   :  { %v4434_v34 = vld [vmem:[%s6462_s0 + $0xa8] sm:$0xff]  ;;  %v4453_v40 = vld [vmem:[%s6462_s0 + $0xc0] sm:$0xff]  ;;  %v4468_v44 = vld [vmem:[%s6462_s0 + $0xd8] sm:$0xff] }
   0x9   :  { %v4473_v45 = vld [vmem:[%s6462_s0 + $0x8] sm:$0xff]  ;;  %v4491_v50 = vld [vmem:[%s6462_s0 + $0x10] sm:$0xff]  ;;  %v4496_v51 = vld [vmem:[%s6462_s0 + $0x20] sm:$0xff] }
   0xa   :  { %151 = vrot.lane.b32.xlu0 %v3496_v4, %s4288_s28  ;;  %153 = vrot.lane.b32.xlu1 %v3497_v5, %s4288_s28  ;;  %v4510_v55 = vld [vmem:[%s6462_s0 + $0x28] sm:$0xff]  ;;  %v4515_v56 = vld [vmem:[%s6462_s0 + $0x38] sm:$0xff] }
   0xb   :  { %v4526_v59 = vld [vmem:[%s6462_s0 + $0x40] sm:$0xff]  ;;  %v4531_v60 = vld [vmem:[%s6462_s0 + $0x50] sm:$0xff]  ;;  %v4542_v63 = vld [vmem:[%s6462_s0 + $0x58] sm:$0xff] }
   0xc   :  { %v4547_v0 = vld [vmem:[%s6462_s0 + $0x68] sm:$0xff]  ;;  %v4558_v3 = vld [vmem:[%s6462_s0 + $0x70] sm:$0xff]  ;;  %v4563_v4 = vld [vmem:[%s6462_s0 + $0x80] sm:$0xff] }
   0xe   :  { %500 = vrot.lane.b32.xlu0 %v3498_v6, %s4289_s18  ;;  %502 = vrot.lane.b32.xlu1 %v3499_v7, %s4289_s18  ;;  %v4574_v7 = vld [vmem:[%s6462_s0 + $0x88] sm:$0xff] }
  0x12   :  { %504 = vrot.lane.b32.xlu0 %v3500_v8, %s4289_s18  ;;  %506 = vrot.lane.b32.xlu1 %v3501_v9, %s4289_s18  ;;  %v4579_v8 = vld [vmem:[%s6462_s0 + $0x98] sm:$0xff] }
  0x16   :  { %508 = vrot.lane.b32.xlu0 %v3502_v10, %s4289_s18  ;;  %510 = vrot.lane.b32.xlu1 %v3503_v11, %s4289_s18 }
  0x74   :  { %v148_v13 = vpop.permute.xlu1 %147  ;;  %v4374_v14 = vpop.permute.xlu0 %143 }
  0x75   :  { %v166_v16 = vmul.f32 %v4374_v14, %v4372_v12  ;;  %v172_v18 = vmul.f32 %v4374_v14, %v4379_v15  ;;  %v178_v27 = vmul.f32 %v4374_v14, %v4403_v23  ;;  %v184_v32 = vmul.f32 %v4374_v14, %v4419_v29 }
  0x76   :  { %v190_v42 = vmul.f32 %v4374_v14, %v4453_v40 }
  0x77   :  { %262 = vrot.lane.b32.xlu0 %v166_v16, %s4290_s10  ;;  %v4595_v16 = vld [vmem:[%s6462_s0 + $0xb0] sm:$0xff] }
  0x78   :  { %v4391_v19 = vpop.permute.xlu1 %149  ;;  %v146_v20 = vpop.permute.xlu0 %145  ;;  %6479 = vst [vmem:[#allocation3_spill] sm:$0xff] %v4595_v16 }
  0x79   :  { %v169_v21 = vmul.f32 %v4391_v19, %v4386_v17  ;;  %v175_v26 = vmul.f32 %v4391_v19, %v4398_v22  ;;  %v181_v31 = vmul.f32 %v4391_v19, %v4414_v28  ;;  %v187_v37 = vmul.f32 %v4391_v19, %v4434_v34 }
  0x7a   :  { %v4463_v43 = vsel %vm155_vm0, %v4374_v14, %v146_v20  ;;  %v193_v46 = vmul.f32 %v4391_v19, %v4468_v44  ;;  %v4482_v48 = vsel %vm155_vm0, %v146_v20, %v148_v13  ;;  %v4590_v13 = vld [vmem:[%s6462_s0 + $0xa0] sm:$0xff] }
  0x7b   :  { %268 = vrot.lane.b32.xlu1 %v169_v21, %s4290_s10  ;;  %274 = vrot.lane.b32.xlu0 %v172_v18, %s4290_s10  ;;  %v167_v47 = vmul.f32 %v4463_v43, %v4473_v45  ;;  %v168_v52 = vmul.f32 %v4482_v48, %v4491_v50  ;;  %v173_v58 = vmul.f32 %v4463_v43, %v4515_v56 }
  0x7c   :  { %v152_v24 = vpop.permute.xlu0 %151  ;;  %v154_v25 = vpop.permute.xlu1 %153  ;;  %v174_v61 = vmul.f32 %v4482_v48, %v4526_v59  ;;  %v179_v2 = vmul.f32 %v4463_v43, %v4547_v0  ;;  %v180_v5 = vmul.f32 %v4482_v48, %v4558_v3  ;;  %v185_v11 = vmul.f32 %v4463_v43, %v4579_v8 }
  0x7d   :  { %v4486_v49 = vsel %vm155_vm0, %v4391_v19, %v152_v24  ;;  %v4505_v54 = vsel %vm155_vm0, %v152_v24, %v154_v25  ;;  %v186_v18 = vmul.f32 %v4482_v48, %v4590_v13  ;;  %v4611_v24 = vld [vmem:[%s6462_s0 + $0xb8] sm:$0xff] }
  0x7e   :  { %v170_v53 = vmul.f32 %v4486_v49, %v4496_v51  ;;  %v171_v57 = vmul.f32 %v4505_v54, %v4510_v55  ;;  %v176_v62 = vmul.f32 %v4486_v49, %v4531_v60  ;;  %v177_v1 = vmul.f32 %v4505_v54, %v4542_v63  ;;  %6480 = vst [vmem:[#allocation4_spill] sm:$0xff] %v4611_v24 }
  0x7f   :  { %280 = vrot.lane.b32.xlu1 %v175_v26, %s4290_s10  ;;  %286 = vrot.lane.b32.xlu0 %v178_v27, %s4290_s10  ;;  %v182_v6 = vmul.f32 %v4486_v49, %v4563_v4  ;;  %v183_v10 = vmul.f32 %v4505_v54, %v4574_v7  ;;  %v188_v20 = vmul.f32 %v4486_v49, %v4595_v16 }
  0x80   :  { %v4423_v30 = vpop.permute.xlu1 %502  ;;  %v4429_v33 = vpop.permute.xlu0 %500  ;;  %v189_v26 = vmul.f32 %v4505_v54, %v4611_v24 }
  0x81   :  { %v523_v35 = vmul.f32 %v4429_v33, %v4372_v12  ;;  %v529_v39 = vmul.f32 %v4429_v33, %v4379_v15  ;;  %v4606_v21 = vsel %vm512_vm1, %v4429_v33, %v4423_v30 }
  0x82   :  { %v524_v27 = vmul.f32 %v4606_v21, %v4473_v45 }
  0x83   :  { %292 = vrot.lane.b32.xlu1 %v181_v31, %s4290_s10  ;;  %298 = vrot.lane.b32.xlu0 %v184_v32, %s4290_s10 }
  0x84   :  { %v4440_v36 = vpop.permute.xlu1 %506  ;;  %v505_v9 = vpop.permute.xlu0 %504 }
  0x85   :  { %v526_v38 = vmul.f32 %v4440_v36, %v4386_v17  ;;  %v532_v41 = vmul.f32 %v4440_v36, %v4398_v22  ;;  %v4621_v32 = vsel %vm512_vm1, %v4423_v30, %v505_v9 }
  0x87   :  { %304 = vrot.lane.b32.xlu1 %v187_v37, %s4290_s10  ;;  %619 = vrot.lane.b32.xlu0 %v523_v35, %s4291_s21 }
  0x88   :  { %v509_v25 = vpop.permute.xlu0 %508  ;;  %v511_v31 = vpop.permute.xlu1 %510 }
  0x89   :  { %v4625_v35 = vsel %vm512_vm1, %v4440_v36, %v509_v25  ;;  %v4630_v37 = vsel %vm512_vm1, %v509_v25, %v511_v31  ;;  %v4711_v25 = vld [vmem:[%s6462_s0 + $0x110] sm:$0xff]  ;;  %v4722_v31 = vld [vmem:[%s6462_s0 + $0x118] sm:$0xff] }
  0x8a   :  { %v528_v30 = vmul.f32 %v4630_v37, %v4510_v55  ;;  %v539_v9 = vmul.f32 %v4625_v35, %v4563_v4 }
  0x8b   :  { %625 = vrot.lane.b32.xlu1 %v526_v38, %s4291_s21  ;;  %631 = vrot.lane.b32.xlu0 %v529_v39, %s4291_s21  ;;  %v525_v38 = vmul.f32 %v4621_v32, %v4491_v50  ;;  %v527_v39 = vmul.f32 %v4625_v35, %v4496_v51 }
  0x8f   :  { %637 = vrot.lane.b32.xlu1 %v532_v41, %s4291_s21  ;;  %310 = vrot.lane.b32.xlu0 %v190_v42, %s4290_s10  ;;  %v530_v41 = vmul.f32 %v4606_v21, %v4515_v56  ;;  %v531_v42 = vmul.f32 %v4621_v32, %v4526_v59 }
  0x93   :  { %316 = vrot.lane.b32.xlu1 %v193_v46, %s4290_s10  ;;  %264 = vrot.lane.b32.xlu0 %v167_v47, %s4290_s10  ;;  %v533_v46 = vmul.f32 %v4625_v35, %v4531_v60  ;;  %v4651_v47 = vld [vmem:[%s6462_s0 + $0xc8] sm:$0xff] }
  0x97   :  { %266 = vrot.lane.b32.xlu1 %v168_v52, %s4290_s10  ;;  %270 = vrot.lane.b32.xlu0 %v170_v53, %s4290_s10  ;;  %v534_v52 = vmul.f32 %v4630_v37, %v4542_v63  ;;  %v191_v53 = vmul.f32 %v4463_v43, %v4651_v47 }
  0x9b   :  { %272 = vrot.lane.b32.xlu1 %v171_v57, %s4290_s10  ;;  %276 = vrot.lane.b32.xlu0 %v173_v58, %s4290_s10  ;;  %v4662_v57 = vld [vmem:[%s6462_s0 + $0xd0] sm:$0xff]  ;;  %v4667_v58 = vld [vmem:[%s6462_s0 + $0xe0] sm:$0xff] }
  0x9f   :  { %278 = vrot.lane.b32.xlu1 %v174_v61, %s4290_s10  ;;  %282 = vrot.lane.b32.xlu0 %v176_v62, %s4290_s10  ;;  %v192_v61 = vmul.f32 %v4482_v48, %v4662_v57  ;;  %v194_v62 = vmul.f32 %v4486_v49, %v4667_v58 }
  0xa3   :  { %284 = vrot.lane.b32.xlu1 %v177_v1, %s4290_s10  ;;  %288 = vrot.lane.b32.xlu0 %v179_v2, %s4290_s10  ;;  %v4678_v1 = vld [vmem:[%s6462_s0 + $0xe8] sm:$0xff] }
  0xa4   :  { %v195_v2 = vmul.f32 %v4505_v54, %v4678_v1 }
  0xa7   :  { %290 = vrot.lane.b32.xlu1 %v180_v5, %s4290_s10  ;;  %294 = vrot.lane.b32.xlu0 %v182_v6, %s4290_s10  ;;  %v536_v5 = vmul.f32 %v4606_v21, %v4547_v0  ;;  %v537_v6 = vmul.f32 %v4621_v32, %v4558_v3 }
  0xab   :  { %296 = vrot.lane.b32.xlu1 %v183_v10, %s4290_s10  ;;  %300 = vrot.lane.b32.xlu0 %v185_v11, %s4290_s10  ;;  %v4695_v10 = vld [vmem:[%s6462_s0 + $0xf8] sm:$0xff]  ;;  %v540_v11 = vmul.f32 %v4630_v37, %v4574_v7 }
  0xaf   :  { %302 = vrot.lane.b32.xlu1 %v186_v18, %s4290_s10  ;;  %306 = vrot.lane.b32.xlu0 %v188_v20, %s4290_s10  ;;  %v197_v18 = vmul.f32 %v4463_v43, %v4695_v10  ;;  %v4706_v20 = vld [vmem:[%s6462_s0 + $0x100] sm:$0xff] }
  0xb3   :  { %308 = vrot.lane.b32.xlu1 %v189_v26, %s4290_s10  ;;  %621 = vrot.lane.b32.xlu0 %v524_v27, %s4291_s21  ;;  %v198_v26 = vmul.f32 %v4482_v48, %v4706_v20  ;;  %v200_v27 = vmul.f32 %v4486_v49, %v4711_v25 }
  0xb7   :  { %623 = vrot.lane.b32.xlu1 %v525_v38, %s4291_s21  ;;  %627 = vrot.lane.b32.xlu0 %v527_v39, %s4291_s21  ;;  %v201_v38 = vmul.f32 %v4505_v54, %v4722_v31  ;;  %v535_v39 = vmul.f32 %v4429_v33, %v4403_v23 }
  0xbb   :  { %629 = vrot.lane.b32.xlu1 %v528_v30, %s4291_s21  ;;  %633 = vrot.lane.b32.xlu0 %v530_v41, %s4291_s21  ;;  %v538_v30 = vmul.f32 %v4440_v36, %v4414_v28  ;;  %v542_v41 = vmul.f32 %v4606_v21, %v4579_v8 }
  0xbf   :  { %635 = vrot.lane.b32.xlu1 %v531_v42, %s4291_s21  ;;  %639 = vrot.lane.b32.xlu0 %v533_v46, %s4291_s21  ;;  %v543_v42 = vmul.f32 %v4621_v32, %v4590_v13  ;;  %v545_v46 = vmul.f32 %v4625_v35, %v4595_v16  ;;  %v4827_v16 = vld [vmem:[%s6462_s0 + $0x120] sm:$0xff] }
  0xc0   :  { %6486 = vst [vmem:[#allocation10_spill] sm:$0xff] %v4827_v16 }
  0xc3   :  { %641 = vrot.lane.b32.xlu1 %v534_v52, %s4291_s21  ;;  %312 = vrot.lane.b32.xlu0 %v191_v53, %s4290_s10  ;;  %v4745_v52 = vld [vmem:[%s6462_s0 + $0xf0] sm:$0xff]  ;;  %v546_v53 = vmul.f32 %v4630_v37, %v4611_v24 }
  0xc7   :  { %314 = vrot.lane.b32.xlu1 %v192_v61, %s4290_s10  ;;  %318 = vrot.lane.b32.xlu0 %v194_v62, %s4290_s10  ;;  %v196_v61 = vmul.f32 %v4374_v14, %v4745_v52  ;;  %v4756_v62 = vld [vmem:[%s6462_s0 + $0x108] sm:$0xff] }
  0xcb   :  { %320 = vrot.lane.b32.xlu1 %v195_v2, %s4290_s10  ;;  %645 = vrot.lane.b32.xlu0 %v536_v5, %s4291_s21  ;;  %v4761_v2 = vld [vmem:[%s6462_s0 + $0x128] sm:$0xff] }
  0xcf   :  { %647 = vrot.lane.b32.xlu1 %v537_v6, %s4291_s21  ;;  %651 = vrot.lane.b32.xlu0 %v539_v9, %s4291_s21  ;;  %v199_v6 = vmul.f32 %v4391_v19, %v4756_v62  ;;  %v203_v9 = vmul.f32 %v4463_v43, %v4761_v2 }
  0xd3   :  { %653 = vrot.lane.b32.xlu1 %v540_v11, %s4291_s21  ;;  %324 = vrot.lane.b32.xlu0 %v197_v18, %s4290_s10  ;;  %v4772_v11 = vld [vmem:[%s6462_s0 + $0x130] sm:$0xff]  ;;  %v4777_v18 = vld [vmem:[%s6462_s0 + $0x140] sm:$0xff] }
  0xd4   :  { %6481 = vst [vmem:[#allocation5_spill] sm:$0xff] %v4772_v11  ;;  %6482 = vst [vmem:[#allocation6_spill] sm:$0xff] %v4777_v18 }
  0xd7   :  { %326 = vrot.lane.b32.xlu1 %v198_v26, %s4290_s10  ;;  %330 = vrot.lane.b32.xlu0 %v200_v27, %s4290_s10 }
  0xdb   :  { %332 = vrot.lane.b32.xlu1 %v201_v38, %s4290_s10  ;;  %643 = vrot.lane.b32.xlu0 %v535_v39, %s4291_s21  ;;  %v204_v38 = vmul.f32 %v4482_v48, %v4772_v11  ;;  %v206_v39 = vmul.f32 %v4486_v49, %v4777_v18 }
  0xdf   :  { %649 = vrot.lane.b32.xlu1 %v538_v30, %s4291_s21  ;;  %657 = vrot.lane.b32.xlu0 %v542_v41, %s4291_s21  ;;  %v4792_v30 = vld [vmem:[%s6462_s0 + $0x148] sm:$0xff] }
  0xe0   :  { %6483 = vst [vmem:[#allocation7_spill] sm:$0xff] %v4792_v30 }
  0xe3   :  { %659 = vrot.lane.b32.xlu1 %v543_v42, %s4291_s21  ;;  %663 = vrot.lane.b32.xlu0 %v545_v46, %s4291_s21  ;;  %v207_v46 = vmul.f32 %v4505_v54, %v4792_v30 }
  0xe7   :  { %665 = vrot.lane.b32.xlu1 %v546_v53, %s4291_s21  ;;  %322 = vrot.lane.b32.xlu0 %v196_v61, %s4290_s10  ;;  %v541_v53 = vmul.f32 %v4429_v33, %v4419_v29 }
  0xe9   :  { %v263_v5 = vpop.permute.xlu0 %262 }
  0xeb   :  { %328 = vrot.lane.b32.xlu1 %v199_v6, %s4290_s10  ;;  %336 = vrot.lane.b32.xlu0 %v203_v9, %s4290_s10  ;;  %v544_v9 = vmul.f32 %v4440_v36, %v4434_v34 }
  0xed   :  { %v4781_v26 = vpop.permute.xlu1 %268  ;;  %v4783_v27 = vpop.permute.xlu0 %274 }
  0xef   :  { %338 = vrot.lane.b32.xlu1 %v204_v38, %s4290_s10  ;;  %342 = vrot.lane.b32.xlu0 %v206_v39, %s4290_s10  ;;  %v548_v38 = vmul.f32 %v4606_v21, %v4651_v47 }
  0xf1   :  { %v4796_v41 = vpop.permute.xlu1 %280  ;;  %v4798_v42 = vpop.permute.xlu0 %286 }
  0xf3   :  { %344 = vrot.lane.b32.xlu1 %v207_v46, %s4290_s10  ;;  %655 = vrot.lane.b32.xlu0 %v541_v53, %s4291_s21  ;;  %v549_v46 = vmul.f32 %v4621_v32, %v4662_v57  ;;  %v551_v53 = vmul.f32 %v4625_v35, %v4667_v58  ;;  %v202_v57 = vmul.f32 %v4374_v14, %v4827_v16  ;;  %v4842_v58 = vld [vmem:[%s6462_s0 + $0x138] sm:$0xff] }
  0xf4   :  { %6489 = vst [vmem:[#allocation13_spill] sm:$0xff] %v4842_v58 }
  0xf5   :  { %v4806_v61 = vpop.permute.xlu1 %292  ;;  %v4808_v6 = vpop.permute.xlu0 %298 }
  0xf7   :  { %661 = vrot.lane.b32.xlu1 %v544_v9, %s4291_s21  ;;  %669 = vrot.lane.b32.xlu0 %v548_v38, %s4291_s21  ;;  %v552_v38 = vmul.f32 %v4630_v37, %v4678_v1  ;;  %v4854_v1 = vld [vmem:[%s6461_s1] sm:$0xff] }
  0xf9   :  { %v4816_v39 = vpop.permute.xlu1 %304  ;;  %v4818_v30 = vpop.permute.xlu0 %619 }
  0xfa   :  { %6484 = vst [vmem:[#allocation8_spill] sm:$0xff] %v4816_v39  ;;  %6485 = vst [vmem:[#allocation9_spill] sm:$0xff] %v4818_v30  ;;  %v4905_v39 = vld [vmem:[%s6462_s0 + $0x178] sm:$0xff] }
  0xfb   :  { %671 = vrot.lane.b32.xlu1 %v549_v46, %s4291_s21  ;;  %675 = vrot.lane.b32.xlu0 %v551_v53, %s4291_s21  ;;  %v4847_v46 = vld [vmem:[%s6462_s0 + $0x158] sm:$0xff] }
  0xfc   :  { %6490 = vst [vmem:[#allocation14_spill] sm:$0xff] %v4847_v46  ;;  %v209_v30 = vmul.f32 %v4463_v43, %v4847_v46  ;;  %v4881_v43 = vld [vmem:[%s6461_s1 + $0x10] sm:$0xff] }
  0xfd   :  { %v4831_v47 = vpop.permute.xlu1 %625  ;;  %v4833_v9 = vpop.permute.xlu0 %631  ;;  %v84_v24 = vmul.f32 %v4881_v43, %v4491_v50  ;;  %v4923_v50 = vld [vmem:[%s6461_s1 + $0x28] sm:$0xff] }
  0xfe   :  { %6487 = vst [vmem:[#allocation11_spill] sm:$0xff] %v4831_v47  ;;  %6488 = vst [vmem:[#allocation12_spill] sm:$0xff] %v4833_v9  ;;  %v205_v47 = vmul.f32 %v4391_v19, %v4842_v58 }
  0xff   :  { %677 = vrot.lane.b32.xlu1 %v552_v38, %s4291_s21  ;;  %334 = vrot.lane.b32.xlu0 %v202_v57, %s4290_s10  ;;  %v4867_v38 = vld [vmem:[%s6462_s0 + $0x160] sm:$0xff]  ;;  %v4872_v57 = vld [vmem:[%s6462_s0 + $0x170] sm:$0xff] }
 0x100   :  { %6493 = vst [vmem:[#allocation17_spill] sm:$0xff] %v4867_v38  ;;  %6494 = vst [vmem:[#allocation18_spill] sm:$0xff] %v4872_v57  ;;  %v212_v58 = vmul.f32 %v4486_v49, %v4872_v57 }
 0x101   :  { %v4856_v53 = vpop.permute.xlu1 %637  ;;  %v4858_v9 = vpop.permute.xlu0 %310 }
 0x102   :  { %6491 = vst [vmem:[#allocation15_spill] sm:$0xff] %v4856_v53  ;;  %6492 = vst [vmem:[#allocation16_spill] sm:$0xff] %v4858_v9  ;;  %v82_v9 = vmul.f32 %v4854_v1, %v4372_v12  ;;  %v4886_v53 = vld [vmem:[%s6461_s1 + $0x8] sm:$0xff]  ;;  %v210_v12 = vmul.f32 %v4482_v48, %v4867_v38  ;;  %v87_v38 = vmul.f32 %v4923_v50, %v4510_v55 }
 0x103   :  { %340 = vrot.lane.b32.xlu1 %v205_v47, %s4290_s10  ;;  %348 = vrot.lane.b32.xlu0 %v209_v30, %s4290_s10  ;;  %v4891_v47 = vld [vmem:[%s6461_s1 + $0x18] sm:$0xff]  ;;  %v83_v48 = vmul.f32 %v4886_v53, %v4473_v45  ;;  %v89_v55 = vmul.f32 %v4886_v53, %v4515_v56 }
 0x104   :  { %v85_v49 = vmul.f32 %v4891_v47, %v4386_v17 }
 0x105   :  { %v4893_v30 = vpop.permute.xlu1 %316  ;;  %v265_v46 = vpop.permute.xlu0 %264 }
 0x106   :  { %6495 = vst [vmem:[#allocation19_spill] sm:$0xff] %v4893_v30  ;;  %v359_v16 = vsel %vm358_vm2, %v263_v5, %v265_v46  ;;  %v4910_v30 = vld [vmem:[%s6461_s1 + $0x20] sm:$0xff] }
 0x107   :  { %v4912_v18 = vadd.f32 %v359_v16, %v82_v9  ;;  %350 = vrot.lane.b32.xlu1 %v210_v12, %s4290_s10  ;;  %354 = vrot.lane.b32.xlu0 %v212_v58, %s4290_s10  ;;  %v213_v16 = vmul.f32 %v4505_v54, %v4905_v39  ;;  %v547_v9 = vmul.f32 %v4429_v33, %v4453_v40 }
 0x108   :  { %v86_v58 = vmul.f32 %v4910_v30, %v4496_v51  ;;  %v88_v40 = vmul.f32 %v4854_v1, %v4379_v15  ;;  %v90_v15 = vmul.f32 %v4881_v43, %v4526_v59  ;;  %v92_v59 = vmul.f32 %v4910_v30, %v4531_v60 }
 0x109   :  { %6496 = vst [vmem:[#allocation20_spill] sm:$0xff] %v4912_v18  ;;  %v267_v5 = vpop.permute.xlu1 %266  ;;  %v271_v57 = vpop.permute.xlu0 %270  ;;  %v94_v60 = vmul.f32 %v4854_v1, %v4403_v23  ;;  %v96_v23 = vmul.f32 %v4881_v43, %v4558_v3 }
 0x10a   :  { %v360_v45 = vsel %vm358_vm2, %v265_v46, %v267_v5  ;;  %v4932_v12 = vadd.f32 %v267_v5, %v84_v24  ;;  %v361_v17 = vsel %vm358_vm2, %v4781_v26, %v271_v57  ;;  %v550_v24 = vmul.f32 %v4440_v36, %v4468_v44 }
 0x10b   :  { %v4938_v18 = vadd.f32 %v360_v45, %v83_v48  ;;  %v4940_v11 = vadd.f32 %v361_v17, %v85_v49  ;;  %356 = vrot.lane.b32.xlu1 %v213_v16, %s4290_s10  ;;  %667 = vrot.lane.b32.xlu0 %v547_v9, %s4291_s21  ;;  %v554_v26 = vmul.f32 %v4606_v21, %v4695_v10 }
 0x10c   :  { %v91_v44 = vmul.f32 %v4891_v47, %v4398_v22  ;;  %v93_v22 = vmul.f32 %v4923_v50, %v4542_v63  ;;  %v558_v63 = vmul.f32 %v4630_v37, %v4722_v31  ;;  %v5009_v31 = vld [vmem:[%s6462_s0 + $0x168] sm:$0xff] }
 0x10d   :  { %v273_v51 = vpop.permute.xlu1 %272  ;;  %v277_v54 = vpop.permute.xlu0 %276  ;;  %v211_v3 = vmul.f32 %v4391_v19, %v5009_v31  ;;  %v3862_v19 = vld [vmem:[%s6463_s3 + $0x4] ss:$24 sps:$4 sm:$0xff]  }
 0x10e   :  { %v362_v46 = vsel %vm358_vm2, %v271_v57, %v273_v51  ;;  %v4953_v48 = vadd.f32 %v273_v51, %v87_v38  ;;  %v363_v49 = vsel %vm358_vm2, %v4783_v27, %v277_v54  ;;  %v555_v38 = vmul.f32 %v4621_v32, %v4706_v20  ;;  %v4983_v20 = vld [vmem:[%s6462_s0 + $0x150] sm:$0xff]  ;;  %2048 = vmatprep.subr.bf16.mxu0 %v3862_v19  ;;  %v6501_v19 = vld [vmem:[#allocation3_spill] sm:$0xff] }
 0x10f   :  { %v4959_v5 = vadd.f32 %v362_v46, %v86_v58  ;;  %v4961_v16 = vadd.f32 %v363_v49, %v88_v40  ;;  %673 = vrot.lane.b32.xlu1 %v550_v24, %s4291_s21  ;;  %681 = vrot.lane.b32.xlu0 %v554_v26, %s4291_s21  ;;  %v557_v27 = vmul.f32 %v4625_v35, %v4711_v25 }
 0x110   :  { %v208_v40 = vmul.f32 %v4374_v14, %v4983_v20  ;;  %v95_v51 = vmul.f32 %v4886_v53, %v4547_v0  ;;  %v97_v0 = vmul.f32 %v4891_v47, %v4414_v28  ;;  %v553_v49 = vmul.f32 %v4429_v33, %v4745_v52 }
 0x111   :  { %v279_v56 = vpop.permute.xlu1 %278  ;;  %v283_v10 = vpop.permute.xlu0 %282  ;;  %v99_v28 = vmul.f32 %v4923_v50, %v4574_v7  ;;  %v3864_v7 = vld [vmem:[%s6463_s3 + $0xc] ss:$24 sps:$4 sm:$0xff]  }
 0x112   :  { %v364_v57 = vsel %vm358_vm2, %v277_v54, %v279_v56  ;;  %v4974_v9 = vadd.f32 %v279_v56, %v90_v15  ;;  %v365_v58 = vsel %vm358_vm2, %v4796_v41, %v283_v10  ;;  %v98_v15 = vmul.f32 %v4910_v30, %v4563_v4  ;;  %2130 = vmatprep.subr.bf16.mxu1 %v3864_v7  ;;  %v3880_v7 = vld [vmem:[%s6463_s3 + $0x94] ss:$24 sps:$4 sm:$0xff]  }
 0x113   :  { %v4985_v45 = vadd.f32 %v364_v57, %v89_v55  ;;  %v4987_v25 = vadd.f32 %v365_v58, %v91_v44  ;;  %683 = vrot.lane.b32.xlu1 %v555_v38, %s4291_s21  ;;  %687 = vrot.lane.b32.xlu0 %v557_v27, %s4291_s21  ;;  %v100_v4 = vmul.f32 %v4854_v1, %v4419_v29  ;;  %v3867_v27 = vld [vmem:[%s6463_s3 + $0x8] ss:$24 sps:$4 sm:$0xff]  }
 0x114   :  { %v556_v58 = vmul.f32 %v4440_v36, %v4756_v62  ;;  %v560_v29 = vmul.f32 %v4606_v21, %v4761_v2  ;;  %v101_v1 = vmul.f32 %v4886_v53, %v4579_v8  ;;  %v3870_v8 = vld [vmem:[%s6463_s3 + $0x3c] ss:$24 sps:$4 sm:$0xff]   ;;  %v103_v53 = vmul.f32 %v4891_v47, %v4434_v34  ;;  %2131 = vmatpush1.bf16.msra.mxu1 %v3867_v27  ;;  %v3876_v47 = vld [vmem:[%s6463_s3 + $0x6c] ss:$24 sps:$4 sm:$0xff]  }
 0x115   :  { %v285_v41 = vpop.permute.xlu1 %284  ;;  %v289_v17 = vpop.permute.xlu0 %288  ;;  %2132 = vmatprep.subr.bf16.mxu1 %v3870_v8  ;;  %v3874_v34 = vld [vmem:[%s6463_s3 + $0x64] ss:$24 sps:$4 sm:$0xff]  }
 0x116   :  { %v366_v54 = vsel %vm358_vm2, %v283_v10, %v285_v41  ;;  %v5000_v24 = vadd.f32 %v285_v41, %v93_v22  ;;  %v367_v26 = vsel %vm358_vm2, %v4798_v42, %v289_v17  ;;  %v102_v22 = vmul.f32 %v4881_v43, %v4590_v13  ;;  %v3873_v43 = vld [vmem:[%s6463_s3 + $0x38] ss:$24 sps:$4 sm:$0xff]  }
 0x117   :  { %v5011_v55 = vadd.f32 %v366_v54, %v92_v59  ;;  %v5013_v14 = vadd.f32 %v367_v26, %v94_v60  ;;  %689 = vrot.lane.b32.xlu1 %v558_v63, %s4291_s21  ;;  %346 = vrot.lane.b32.xlu0 %v208_v40, %s4290_s10  ;;  %v3868_v60 = vld [vmem:[%s6463_s3 + $0x34] ss:$24 sps:$4 sm:$0xff]   ;;  %v6498_v26 = vld [vmem:[#allocation6_spill] sm:$0xff] }
 0x118   :  { %2133 = vmatpush1.bf16.msra.mxu1 %v3873_v43  ;;  %v3885_v43 = vld [vmem:[%s6463_s3 + $0x98] ss:$24 sps:$4 sm:$0xff]  }
 0x119   :  { %v291_v42 = vpop.permute.xlu1 %290  ;;  %v295_v46 = vpop.permute.xlu0 %294  ;;  %2134 = vmatprep.subr.bf16.mxu1 %v3876_v47 }
 0x11a   :  { %v368_v44 = vsel %vm358_vm2, %v289_v17, %v291_v42  ;;  %v5026_v56 = vadd.f32 %v291_v42, %v96_v23  ;;  %v369_v10 = vsel %vm358_vm2, %v4806_v61, %v295_v46  ;;  %v3866_v61 = vld [vmem:[%s6463_s3] ss:$24 sps:$4 sm:$0xff]   ;;  %v563_v23 = vmul.f32 %v4625_v35, %v6498_v26  ;;  %v6506_v26 = vld [vmem:[#allocation13_spill] sm:$0xff] }
 0x11b   :  { %v5035_v38 = vadd.f32 %v368_v44, %v95_v51  ;;  %v5037_v52 = vadd.f32 %v369_v10, %v97_v0  ;;  %352 = vrot.lane.b32.xlu1 %v211_v3, %s4290_s10  ;;  %679 = vrot.lane.b32.xlu0 %v553_v49, %s4291_s21  ;;  %v6497_v51 = vld [vmem:[#allocation5_spill] sm:$0xff]  ;;  %v6500_v49 = vld [vmem:[#allocation4_spill] sm:$0xff]  ;;  %v3878_v44 = vld [vmem:[%s6463_s3 + $0x60] ss:$24 sps:$4 sm:$0xff]  }
 0x11c   :  { %2049 = vmatpush1.bf16.msra.mxu0 %v3866_v61  ;;  %v561_v54 = vmul.f32 %v4621_v32, %v6497_v51 }
 0x11d   :  { %v297_v59 = vpop.permute.xlu1 %296  ;;  %v301_v57 = vpop.permute.xlu0 %300  ;;  %2050 = vmatprep.subr.bf16.mxu0 %v3868_v60  ;;  %v6504_v60 = vld [vmem:[#allocation9_spill] sm:$0xff] }
 0x11e   :  { %v370_v41 = vsel %vm358_vm2, %v295_v46, %v297_v59  ;;  %v5064_v17 = vadd.f32 %v297_v59, %v99_v28  ;;  %v371_v62 = vsel %vm358_vm2, %v4808_v6, %v301_v57  ;;  %v3872_v6 = vld [vmem:[%s6463_s3 + $0x30] ss:$24 sps:$4 sm:$0xff]   ;;  %v6502_v59 = vld [vmem:[#allocation7_spill] sm:$0xff] }
 0x11f   :  { %v5071_v2 = vadd.f32 %v370_v41, %v98_v15  ;;  %v5073_v13 = vadd.f32 %v371_v62, %v100_v4  ;;  %685 = vrot.lane.b32.xlu1 %v556_v58, %s4291_s21  ;;  %693 = vrot.lane.b32.xlu0 %v560_v29, %s4291_s21  ;;  %v6499_v46 = vld [vmem:[#allocation8_spill] sm:$0xff]  ;;  %v105_v15 = vmul.f32 %v4923_v50, %v6500_v49  ;;  %v6503_v58 = vld [vmem:[#allocation10_spill] sm:$0xff]  ;;  %v6508_v49 = vld [vmem:[#allocation11_spill] sm:$0xff] }
 0x120   :  { %2051 = vmatpush1.bf16.msra.mxu0 %v3872_v6  ;;  %v104_v4 = vmul.f32 %v4910_v30, %v6501_v19  ;;  %v3879_v50 = vld [vmem:[%s6463_s3 + $0x68] ss:$24 sps:$4 sm:$0xff]   ;;  %v559_v29 = vmul.f32 %v4429_v33, %v6503_v58  ;;  %v3882_v30 = vld [vmem:[%s6463_s3 + $0x9c] ss:$24 sps:$4 sm:$0xff]  }
 0x121   :  { %v303_v63 = vpop.permute.xlu1 %302  ;;  %v307_v40 = vpop.permute.xlu0 %306  ;;  %2052 = vmatprep.subr.bf16.mxu0 %v3874_v34  ;;  %v3884_v62 = vld [vmem:[%s6463_s3 + $0x90] ss:$24 sps:$4 sm:$0xff]   ;;  %2135 = vmatpush1.bf16.msra.mxu1 %v3879_v50  ;;  %v6507_v34 = vld [vmem:[#allocation14_spill] sm:$0xff] }
 0x122   :  { %v372_v0 = vsel %vm358_vm2, %v301_v57, %v303_v63  ;;  %v5096_v42 = vadd.f32 %v303_v63, %v102_v22  ;;  %v373_v3 = vsel %vm358_vm2, %v6499_v46, %v307_v40  ;;  %v564_v57 = vmul.f32 %v4630_v37, %v6502_v59  ;;  %v3886_v63 = vld [vmem:[%s6463_s3 + $0xc4] ss:$24 sps:$4 sm:$0xff]   ;;  %2136 = vmatprep.subr.bf16.mxu1 %v3882_v30 }
 0x123   :  { %v5105_v10 = vadd.f32 %v372_v0, %v101_v1  ;;  %v5107_v28 = vadd.f32 %v373_v3, %v103_v53  ;;  %695 = vrot.lane.b32.xlu1 %v561_v54, %s4291_s21  ;;  %699 = vrot.lane.b32.xlu0 %v563_v23, %s4291_s21  ;;  %v6505_v53 = vld [vmem:[#allocation20_spill] sm:$0xff]  ;;  %v562_v23 = vmul.f32 %v4440_v36, %v6506_v26  ;;  %v3890_v0 = vld [vmem:[%s6463_s3 + $0xc0] ss:$24 sps:$4 sm:$0xff]   ;;  %v3898_v26 = vld [vmem:[%s6463_s3 + $0x124] ss:$24 sps:$4 sm:$0xff]  }
 0x124   :  { %2053 = vmatpush1.bf16.msra.mxu0 %v3878_v44  ;;  %v566_v47 = vmul.f32 %v4606_v21, %v6507_v34  ;;  %v3891_v44 = vld [vmem:[%s6463_s3 + $0xc8] ss:$24 sps:$4 sm:$0xff]   ;;  %v3892_v21 = vld [vmem:[%s6463_s3 + $0xf4] ss:$24 sps:$4 sm:$0xff]  }
 0x125   :  { %v309_v61 = vpop.permute.xlu1 %308  ;;  %v622_v27 = vpop.permute.xlu0 %621  ;;  %2054 = vmatprep.subr.bf16.mxu0 %v3880_v7  ;;  %2137 = vmatpush1.bf16.msra.mxu1 %v3885_v43 }
 0x126   :  { %v374_v1 = vsel %vm358_vm2, %v307_v40, %v309_v61  ;;  %v5127_v22 = vadd.f32 %v309_v61, %v105_v15  ;;  %v716_v41 = vsel %vm715_vm3, %v6504_v60, %v622_v27  ;;  %v3888_v40 = vld [vmem:[%s6463_s3 + $0xcc] ss:$24 sps:$4 sm:$0xff]  }
 0x127   :  { %v5134_v8 = vadd.f32 %v374_v1, %v104_v4  ;;  %v796_v6 = vadd.f32 %v716_v41, %v6505_v53  ;;  %701 = vrot.lane.b32.xlu1 %v564_v57, %s4291_s21  ;;  %691 = vrot.lane.b32.xlu0 %v559_v29, %s4291_s21  ;;  %v6511_v29 = vld [vmem:[#allocation12_spill] sm:$0xff] }
 0x128   :  { %2055 = vmatpush1.bf16.msra.mxu0 %v3884_v62  ;;  %2138 = vmatprep.subr.bf16.mxu1 %v3888_v40  ;;  %v565_v40 = vmul.f32 %v4429_v33, %v4983_v20  ;;  %v3902_v33 = vld [vmem:[%s6463_s3 + $0x120] ss:$24 sps:$4 sm:$0xff]  }
 0x129   :  { %v624_v51 = vpop.permute.xlu1 %623  ;;  %v628_v54 = vpop.permute.xlu0 %627  ;;  %2056 = vmatprep.subr.bf16.mxu0 %v3886_v63  ;;  %2139 = vmatpush1.bf16.msra.mxu1 %v3891_v44 }
 0x12a   :  { %v717_v46 = vsel %vm715_vm3, %v622_v27, %v624_v51  ;;  %v798_v3 = vadd.f32 %v624_v51, %v4932_v12  ;;  %v718_v15 = vsel %vm715_vm3, %v6508_v49, %v628_v54  ;;  %v3894_v12 = vld [vmem:[%s6463_s3 + $0xfc] ss:$24 sps:$4 sm:$0xff]   ;;  %v6512_v51 = vld [vmem:[#allocation15_spill] sm:$0xff] }
 0x12b   :  { %v797_v19 = vadd.f32 %v717_v46, %v4938_v18  ;;  %v799_v4 = vadd.f32 %v718_v15, %v4940_v11  ;;  %697 = vrot.lane.b32.xlu1 %v562_v23, %s4291_s21  ;;  %705 = vrot.lane.b32.xlu0 %v566_v47, %s4291_s21  ;;  %v6509_v27 = vld [vmem:[#allocation17_spill] sm:$0xff]  ;;  %v6510_v18 = vld [vmem:[#allocation18_spill] sm:$0xff]  ;;  %v3900_v23 = vld [vmem:[%s6463_s3 + $0x12c] ss:$24 sps:$4 sm:$0xff]  }
 0x12c   :  { %v567_v59 = vmul.f32 %v4621_v32, %v6509_v27  ;;  %v569_v11 = vmul.f32 %v4625_v35, %v6510_v18  ;;  %2057 = vmatpush1.bf16.msra.mxu0 %v3890_v0  ;;  %v859_v1 = vsel %vm858_vm4, %v798_v3, 0.0  ;;  %v570_v35 = vmul.f32 %v4630_v37, %v4905_v39  ;;  %2140 = vmatprep.subr.bf16.mxu1 %v3894_v12  ;;  %v3903_v46 = vld [vmem:[%s6463_s3 + $0x128] ss:$24 sps:$4 sm:$0xff]   ;;  %v3904_v3 = vld [vmem:[%s6463_s3 + $0x154] ss:$24 sps:$4 sm:$0xff]  }
 0x12d   :  { %v844_v50 = vadd.f32 %v799_v4, %v796_v6  ;;  %v630_v7 = vpop.permute.xlu1 %629  ;;  %v634_v61 = vpop.permute.xlu0 %633  ;;  %2058 = vmatprep.subr.bf16.mxu0 %v3892_v21  ;;  %v3908_v4 = vld [vmem:[%s6463_s3 + $0x150] ss:$24 sps:$4 sm:$0xff]  }
 0x12e   :  { %v719_v57 = vsel %vm715_vm3, %v628_v54, %v630_v7  ;;  %v801_v58 = vadd.f32 %v630_v7, %v4953_v48  ;;  %v720_v30 = vsel %vm715_vm3, %v6511_v29, %v634_v61  ;;  %v3896_v48 = vld [vmem:[%s6463_s3 + $0xf0] ss:$24 sps:$4 sm:$0xff]  }
 0x12f   :  { %v845_v60 = vrot.slane %v844_v50, 4  ;;  %v800_v41 = vadd.f32 %v719_v57, %v4959_v5  ;;  %v802_v62 = vadd.f32 %v720_v30, %v4961_v16  ;;  %707 = vrot.lane.b32.xlu1 %v567_v59, %s4291_s21  ;;  %711 = vrot.lane.b32.xlu0 %v569_v11, %s4291_s21  ;;  %v3897_v5 = vld [vmem:[%s6463_s3 + $0xf8] ss:$24 sps:$4 sm:$0xff]  }
 0x130   :  { %v860_v32 = vsel %vm858_vm4, %v801_v58, 0.0  ;;  %2059 = vmatpush1.bf16.msra.mxu0 %v3896_v48  ;;  %2141 = vmatpush1.bf16.msra.mxu1 %v3897_v5 }
 0x131   :  { %v846_v16 = vadd.f32 %v845_v60, %v844_v50  ;;  %v851_v53 = vadd.f32 %v800_v41, %v797_v19  ;;  %v861_v6 = vadd.f32 %v860_v32, %v859_v1  ;;  %v636_v43 = vpop.permute.xlu1 %635  ;;  %v640_v63 = vpop.permute.xlu0 %639  ;;  %2060 = vmatprep.subr.bf16.mxu0 %v3898_v26  ;;  %v568_v19 = vmul.f32 %v4440_v36, %v5009_v31  ;;  %v3909_v36 = vld [vmem:[%s6463_s3 + $0x158] ss:$24 sps:$4 sm:$0xff]   ;;  %v3910_v31 = vld [vmem:[%s6463_s3 + $0x184] ss:$24 sps:$4 sm:$0xff]  }
 0x132   :  { %v721_v37 = vsel %vm715_vm3, %v634_v61, %v636_v43  ;;  %v804_v39 = vadd.f32 %v636_v43, %v4974_v9  ;;  %v722_v54 = vsel %vm715_vm3, %v6512_v51, %v640_v63  ;;  %2142 = vmatprep.subr.bf16.mxu1 %v3900_v23  ;;  %v6513_v61 = vld [vmem:[#allocation16_spill] sm:$0xff] }
 0x133   :  { %v847_v20 = vrot.slane %v846_v16, 2  ;;  %v852_v34 = vrot.slane %v851_v53, 4  ;;  %v862_v47 = vrot.slane %v861_v6, 4  ;;  %v803_v9 = vadd.f32 %v721_v37, %v4985_v45  ;;  %713 = vrot.lane.b32.xlu1 %v570_v35, %s4291_s21  ;;  %703 = vrot.lane.b32.xlu0 %v565_v40, %s4291_s21  ;;  %v3912_v35 = vld [vmem:[%s6463_s3 + $0x18c] ss:$24 sps:$4 sm:$0xff]  }
 0x134   :  { %v805_v0 = vadd.f32 %v722_v54, %v4987_v25  ;;  %v3906_v25 = vld [vmem:[%s6463_s3 + $0x15c] ss:$24 sps:$4 sm:$0xff]   ;;  %2061 = vmatpush1.bf16.msra.mxu0 %v3902_v33  ;;  %v882_v58 = vsel %vm858_vm4, %v804_v39, 0.0  ;;  %2143 = vmatpush1.bf16.msra.mxu1 %v3903_v46  ;;  %v6514_v54 = vld [vmem:[#allocation19_spill] sm:$0xff] }
 0x135   :  { %v848_v49 = vadd.f32 %v847_v20, %v846_v16  ;;  %v853_v15 = vadd.f32 %v852_v34, %v851_v53  ;;  %v863_v44 = vadd.f32 %v862_v47, %v861_v6  ;;  %v642_v45 = vpop.permute.xlu1 %641  ;;  %v313_v21 = vpop.permute.xlu0 %312  ;;  %2062 = vmatprep.subr.bf16.mxu0 %v3904_v3  ;;  %2144 = vmatprep.subr.bf16.mxu1 %v3906_v25  ;;  %v3914_v53 = vld [vmem:[%s6463_s3 + $0x180] ss:$24 sps:$4 sm:$0xff]   ;;  %v3916_v37 = vld [vmem:[%s6463_s3 + $0x1b4] ss:$24 sps:$4 sm:$0xff]  }
 0x136   :  { %v868_v12 = vadd.f32 %v805_v0, %v802_v62  ;;  %v723_v50 = vsel %vm715_vm3, %v640_v63, %v642_v45  ;;  %v807_v7 = vadd.f32 %v642_v45, %v5000_v24  ;;  %v5231_v27 = vsel %vm358_vm2, %v6513_v61, %v313_v21  ;;  %v3915_v23 = vld [vmem:[%s6463_s3 + $0x188] ss:$24 sps:$4 sm:$0xff]   ;;  %v3918_v0 = vld [vmem:[%s6463_s3 + $0x1bc] ss:$24 sps:$4 sm:$0xff]  }
 0x137   :  { %v849_v59 = vrot.slane %v848_v49, 1  ;;  %v854_v18 = vrot.slane %v853_v15, 2  ;;  %v864_v11 = vrot.slane %v863_v44, 2  ;;  %v806_v57 = vadd.f32 %v723_v50, %v5011_v55  ;;  %709 = vrot.lane.b32.xlu1 %v568_v19, %s4291_s21 }
 0x138   :  { %v5244_v24 = vstv %s6464_s2  ;;  %v869_v29 = vrot.slane %v868_v12, 4  ;;  %v883_v30 = vsel %vm858_vm4, %v807_v7, 0.0  ;;  %2063 = vmatpush1.bf16.msra.mxu0 %v3908_v4  ;;  %2145 = vmatpush1.bf16.msra.mxu1 %v3909_v36  ;;  %v3921_v4 = vld [vmem:[%s6463_s3 + $0x1b8] ss:$24 sps:$4 sm:$0xff]  }
 0x139   :  { %v850_v1 = vadd.f32 %v849_v59, %v848_v49  ;;  %v855_v60 = vadd.f32 %v854_v18, %v853_v15  ;;  %v865_v41 = vadd.f32 %v864_v11, %v863_v44  ;;  %v875_v62 = vadd.f32 %v806_v57, %v803_v9  ;;  %v5248_v32 = vpop.permute.xlu1 %314  ;;  %v319_v55 = vpop.permute.xlu0 %318  ;;  %2064 = vmatprep.subr.bf16.mxu0 %v3910_v31  ;;  %v3920_v15 = vld [vmem:[%s6463_s3 + $0x1b0] ss:$24 sps:$4 sm:$0xff]   ;;  %v3924_v31 = vld [vmem:[%s6463_s3 + $0x1ec] ss:$24 sps:$4 sm:$0xff]  }
 0x13a   :  { %v870_v48 = vadd.f32 %v869_v29, %v868_v12  ;;  %v884_v5 = vadd.f32 %v883_v30, %v882_v58  ;;  %v5255_v16 = vsel %vm358_vm2, %v313_v21, %v5248_v32  ;;  %v5266_v26 = vsel %vm358_vm2, %v6514_v54, %v319_v55  ;;  %2146 = vmatprep.subr.bf16.mxu1 %v3912_v35  ;;  %v3922_v21 = vld [vmem:[%s6463_s3 + $0x1e4] ss:$24 sps:$4 sm:$0xff]   ;;  %v3926_v58 = vld [vmem:[%s6463_s3 + $0x1e0] ss:$24 sps:$4 sm:$0xff]  }
 0x13b   :  { %v1031_v6 = vadd.f32 %v5244_v24, %v850_v1  ;;  %v856_v43 = vrot.slane %v855_v60, 1  ;;  %v866_v63 = vrot.slane %v865_v41, 1  ;;  %v876_v40 = vrot.slane %v875_v62, 4 }
 0x13c   :  { %v871_v39 = vrot.slane %v870_v48, 2  ;;  %v885_v51 = vrot.slane %v884_v5, 4  ;;  %2065 = vmatpush1.bf16.msra.mxu0 %v3914_v53  ;;  %2147 = vmatpush1.bf16.msra.mxu1 %v3915_v23  ;;  %v3934_v23 = vld [vmem:[%s6463_s3 + $0x244] ss:$24 sps:$4 sm:$0xff]  }
 0x13d   :  { %v857_v33 = vadd.f32 %v856_v43, %v855_v60  ;;  %v867_v20 = vadd.f32 %v866_v63, %v865_v41  ;;  %v877_v34 = vadd.f32 %v876_v40, %v875_v62  ;;  %v5271_v47 = vpop.permute.xlu1 %320  ;;  %v5273_v9 = vpop.permute.xlu0 %645  ;;  %v1055_v44 = vmax.f32 %v1031_v6, 0.0  ;;  %2066 = vmatprep.subr.bf16.mxu0 %v3916_v37  ;;  %2148 = vmatprep.subr.bf16.mxu1 %v3918_v0  ;;  %v3928_v60 = vld [vmem:[%s6463_s3 + $0x214] ss:$24 sps:$4 sm:$0xff]   ;;  %v3932_v37 = vld [vmem:[%s6463_s3 + $0x210] ss:$24 sps:$4 sm:$0xff]  }
 0x13e   :  { %v872_v46 = vadd.f32 %v871_v39, %v870_v48  ;;  %v886_v3 = vadd.f32 %v885_v51, %v884_v5  ;;  %v5280_v49 = vsel %vm358_vm2, %v319_v55, %v5271_v47  ;;  %v3933_v0 = vld [vmem:[%s6463_s3 + $0x218] ss:$24 sps:$4 sm:$0xff]  }
 0x13f   :  { %v878_v45 = vrot.slane %v877_v34, 2  ;;  %v1032_v12 = vadd.f32 %v5244_v24, %v857_v33  ;;  %v1033_v50 = vadd.f32 %v5244_v24, %v867_v20  ;;  %v1079_v29 = vpack.c.bf16 %v1055_v44, %v1055_v44 }
 0x140   :  { %v873_v19 = vrot.slane %v872_v46, 1  ;;  %v887_v25 = vrot.slane %v886_v3, 2  ;;  %2067 = vmatpush1.bf16.msra.mxu0 %v3920_v15  ;;  %2149 = vmatpush1.bf16.msra.mxu1 %v3921_v4 }
 0x141   :  { %v879_v7 = vadd.f32 %v878_v45, %v877_v34  ;;  %v648_v61 = vpop.permute.xlu1 %647  ;;  %v5293_v36 = vpop.permute.xlu0 %651  ;;  %2068 = vmatprep.subr.bf16.mxu0 %v3922_v21  ;;  %v1056_v55 = vmax.f32 %v1032_v12, 0.0  ;;  %v1057_v35 = vmax.f32 %v1033_v50, 0.0  ;;  %2150 = vmatprep.subr.bf16.mxu1 %v3924_v31  ;;  %v1294_v39 = vunpack.c.l.b16 %v1079_v29  ;;  %v3936_v21 = vld [vmem:[%s6463_s3 + $0x24c] ss:$24 sps:$4 sm:$0xff]   ;;  %v3938_v50 = vld [vmem:[%s6463_s3 + $0x240] ss:$24 sps:$4 sm:$0xff]  }
 0x142   :  { %v874_v59 = vadd.f32 %v873_v19, %v872_v46  ;;  %v888_v18 = vadd.f32 %v887_v25, %v886_v3  ;;  %v725_v11 = vsel %vm715_vm3, %v5273_v9, %v648_v61  ;;  %v810_v57 = vadd.f32 %v648_v61, %v5026_v56  ;;  %v3927_v56 = vld [vmem:[%s6463_s3 + $0x1e8] ss:$24 sps:$4 sm:$0xff]  }
 0x143   :  { %v880_v30 = vrot.slane %v879_v7, 1  ;;  %v809_v1 = vadd.f32 %v725_v11, %v5035_v38  ;;  %v3930_v38 = vld [vmem:[%s6463_s3 + $0x21c] ss:$24 sps:$4 sm:$0xff]   ;;  %v1080_v46 = vpack.c.bf16 %v1056_v55, %v1056_v55  ;;  %v1081_v19 = vpack.c.bf16 %v1057_v35, %v1057_v35  ;;  %v3939_v11 = vld [vmem:[%s6463_s3 + $0x248] ss:$24 sps:$4 sm:$0xff]  }
 0x144   :  { %v1034_v41 = vadd.f32 %v5244_v24, %v874_v59  ;;  %v889_v62 = vrot.slane %v888_v18, 1  ;;  %2069 = vmatpush1.bf16.msra.mxu0 %v3926_v58  ;;  %2151 = vmatpush1.bf16.msra.mxu1 %v3927_v56  ;;  %v3940_v59 = vld [vmem:[%s6463_s3 + $0x274] ss:$24 sps:$4 sm:$0xff]  }
 0x145   :  { %v881_v48 = vadd.f32 %v880_v30, %v879_v7  ;;  %v654_v5 = vpop.permute.xlu1 %653  ;;  %v5312_v53 = vpop.permute.xlu0 %324  ;;  %2070 = vmatprep.subr.bf16.mxu0 %v3928_v60  ;;  %2152 = vmatprep.subr.bf16.mxu1 %v3930_v38  ;;  %v1295_v58 = vunpack.c.l.b16 %v1080_v46  ;;  %v1296_v56 = vunpack.c.l.b16 %v1081_v19  ;;  %v3952_v46 = vld [vmem:[%s6463_s3 + $0x2d4] ss:$24 sps:$4 sm:$0xff]  }
 0x146   :  { %v1058_v6 = vmax.f32 %v1034_v41, 0.0  ;;  %v890_v43 = vadd.f32 %v889_v62, %v888_v18  ;;  %v727_v63 = vsel %vm715_vm3, %v5293_v36, %v654_v5  ;;  %v813_v40 = vadd.f32 %v654_v5, %v5064_v17  ;;  %v3942_v62 = vld [vmem:[%s6463_s3 + $0x27c] ss:$24 sps:$4 sm:$0xff]   ;;  %v3944_v5 = vld [vmem:[%s6463_s3 + $0x270] ss:$24 sps:$4 sm:$0xff]  }
 0x147   :  { %v1035_v51 = vadd.f32 %v5244_v24, %v881_v48  ;;  %v812_v54 = vadd.f32 %v727_v63, %v5071_v2  ;;  %v905_v17 = vsel %vm858_vm4, %v810_v57, 0.0  ;;  %v3946_v63 = vld [vmem:[%s6463_s3 + $0x2a4] ss:$24 sps:$4 sm:$0xff]  }
 0x148   :  { %v1082_v33 = vpack.c.bf16 %v1058_v6, %v1058_v6  ;;  %v1036_v20 = vadd.f32 %v5244_v24, %v890_v43  ;;  %v906_v34 = vsel %vm858_vm4, %v813_v40, 0.0  ;;  %2071 = vmatpush1.bf16.msra.mxu0 %v3932_v37  ;;  %2153 = vmatpush1.bf16.msra.mxu1 %v3933_v0 }
 0x149   :  { %v1059_v3 = vmax.f32 %v1035_v51, 0.0  ;;  %v898_v2 = vadd.f32 %v812_v54, %v809_v1  ;;  %v907_v15 = vadd.f32 %v906_v34, %v905_v17  ;;  %v5334_v44 = vpop.permute.xlu1 %326  ;;  %v5336_v45 = vpop.permute.xlu0 %330  ;;  %2072 = vmatprep.subr.bf16.mxu0 %v3934_v23  ;;  %2154 = vmatprep.subr.bf16.mxu1 %v3936_v21  ;;  %v3948_v23 = vld [vmem:[%s6463_s3 + $0x2ac] ss:$24 sps:$4 sm:$0xff]  }
 0x14a   :  { %v1297_v25 = vunpack.c.l.b16 %v1082_v33  ;;  %v1060_v4 = vmax.f32 %v1036_v20, 0.0  ;;  %v5344_v12 = vsel %vm358_vm2, %v5312_v53, %v5334_v44  ;;  %v3950_v20 = vld [vmem:[%s6463_s3 + $0x2a0] ss:$24 sps:$4 sm:$0xff]  }
 0x14b   :  { %v1083_v7 = vpack.c.bf16 %v1059_v3, %v1059_v3  ;;  %v899_v61 = vrot.slane %v898_v2, 4  ;;  %v908_v31 = vrot.slane %v907_v15, 4  ;;  %v3951_v3 = vld [vmem:[%s6463_s3 + $0x2a8] ss:$24 sps:$4 sm:$0xff]  }
 0x14c   :  { %v1084_v18 = vpack.c.bf16 %v1060_v4, %v1060_v4  ;;  %v5356_v57 = vsel %vm1318_vm5, %v1297_v25, %v1294_v39  ;;  %2073 = vmatpush1.bf16.msra.mxu0 %v3938_v50  ;;  %2155 = vmatpush1.bf16.msra.mxu1 %v3939_v11  ;;  %v3956_v25 = vld [vmem:[%s6463_s3 + $0x2d0] ss:$24 sps:$4 sm:$0xff]  }
 0x14d   :  { %v1298_v29 = vunpack.c.l.b16 %v1083_v7  ;;  %v900_v30 = vadd.f32 %v899_v61, %v898_v2  ;;  %v909_v1 = vadd.f32 %v908_v31, %v907_v15  ;;  %v5358_v60 = vpop.permute.xlu1 %332  ;;  %v644_v41 = vpop.permute.xlu0 %643  ;;  %2074 = vmatprep.subr.bf16.mxu0 %v3940_v59  ;;  %2156 = vmatprep.subr.bf16.mxu1 %v3942_v62  ;;  %v3957_v11 = vld [vmem:[%s6463_s3 + $0x2d8] ss:$24 sps:$4 sm:$0xff]  }
 0x14e   :  { %v1299_v55 = vunpack.c.l.b16 %v1084_v18  ;;  %v5366_v35 = vsel %vm358_vm2, %v5336_v45, %v5358_v60  ;;  %v724_v48 = vsel %vm715_vm3, %v644_v41, %v5273_v9  ;;  %v3945_v9 = vld [vmem:[%s6463_s3 + $0x278] ss:$24 sps:$4 sm:$0xff]   ;;  %v3960_v18 = vld [vmem:[%s6463_s3 + $0x304] ss:$24 sps:$4 sm:$0xff]  }
 0x14f   :  { %v901_v38 = vrot.slane %v900_v30, 2  ;;  %v910_v6 = vrot.slane %v909_v1, 2  ;;  %v808_v43 = vadd.f32 %v724_v48, %v5013_v14  ;;  %v5384_v37 = vsel %vm1318_vm5, %v1298_v29, %v1295_v58 }
 0x150   :  { %v5378_v40 = vsel %vm1318_vm5, %v1299_v55, %v1296_v56  ;;  %2075 = vmatpush1.bf16.msra.mxu0 %v3944_v5  ;;  %2157 = vmatpush1.bf16.msra.mxu1 %v3945_v9 }
 0x151   :  { %v902_v39 = vadd.f32 %v901_v38, %v900_v30  ;;  %v911_v51 = vadd.f32 %v910_v6, %v909_v1  ;;  %v650_v54 = vpop.permute.xlu1 %649  ;;  %v5386_v14 = vpop.permute.xlu0 %657  ;;  %2076 = vmatprep.subr.bf16.mxu0 %v3946_v63  ;;  %2158 = vmatprep.subr.bf16.mxu1 %v3948_v23 }
 0x152   :  { %v726_v33 = vsel %vm715_vm3, %v650_v54, %v5293_v36 }
 0x153   :  { %v903_v17 = vrot.slane %v902_v39, 1  ;;  %v912_v34 = vrot.slane %v911_v51, 1  ;;  %v811_v0 = vadd.f32 %v726_v33, %v5037_v52  ;;  %v3954_v52 = vld [vmem:[%s6463_s3 + $0x2dc] ss:$24 sps:$4 sm:$0xff]  }
 0x154   :  { %2077 = vmatpush1.bf16.msra.mxu0 %v3950_v20  ;;  %2159 = vmatpush1.bf16.msra.mxu1 %v3951_v3 }
 0x155   :  { %v904_v36 = vadd.f32 %v903_v17, %v902_v39  ;;  %v913_v2 = vadd.f32 %v912_v34, %v911_v51  ;;  %v891_v15 = vadd.f32 %v811_v0, %v808_v43  ;;  %v660_v21 = vpop.permute.xlu1 %659  ;;  %v5403_v19 = vpop.permute.xlu0 %663  ;;  %2078 = vmatprep.subr.bf16.mxu0 %v3952_v46  ;;  %2160 = vmatprep.subr.bf16.mxu1 %v3954_v52 }
 0x156   :  { %v729_v4 = vsel %vm715_vm3, %v5386_v14, %v660_v21  ;;  %v816_v50 = vadd.f32 %v660_v21, %v5096_v42  ;;  %v3963_v42 = vld [vmem:[%s6463_s3 + $0x30c] ss:$24 sps:$4 sm:$0xff]  }
 0x157   :  { %v1038_v7 = vadd.f32 %v5244_v24, %v904_v36  ;;  %v1039_v61 = vadd.f32 %v5244_v24, %v913_v2  ;;  %v892_v31 = vrot.slane %v891_v15, 4  ;;  %v815_v59 = vadd.f32 %v729_v4, %v5105_v10 }
 0x158   :  { %2079 = vmatpush1.bf16.msra.mxu0 %v3956_v25  ;;  %v928_v6 = vsel %vm858_vm4, %v816_v50, 0.0  ;;  %2161 = vmatpush1.bf16.msra.mxu1 %v3957_v11  ;;  %v5471_v11 = vld [vmem:[%s6461_s1 + $0x10] sm:$0xff] }
 0x159   :  { %v1062_v58 = vmax.f32 %v1038_v7, 0.0  ;;  %v1063_v29 = vmax.f32 %v1039_v61, 0.0  ;;  %v893_v30 = vadd.f32 %v892_v31, %v891_v15  ;;  %v666_v1 = vpop.permute.xlu1 %665  ;;  %v323_v41 = vpop.permute.xlu0 %322  ;;  %2089 = vmatprep.subr.bf16.mxu0 %v3960_v18  ;;  %2171 = vmatprep.subr.bf16.mxu1 %v3963_v42  ;;  %v4258_v18 = vld [vmem:[%s6462_s0 + $0xd0] sm:$0xff] }
 0x15a   :  { %v731_v10 = vsel %vm715_vm3, %v5403_v19, %v666_v1  ;;  %v819_v62 = vadd.f32 %v666_v1, %v5127_v22  ;;  %v5431_v56 = vsel %vm358_vm2, %v323_v41, %v5312_v53  ;;  %v108_v42 = vmul.f32 %v5471_v11, %v4258_v18 }
 0x15b   :  { %v1086_v55 = vpack.c.bf16 %v1062_v58, %v1062_v58  ;;  %v1087_v48 = vpack.c.bf16 %v1063_v29, %v1063_v29  ;;  %v894_v5 = vrot.slane %v893_v30, 2  ;;  %v818_v38 = vadd.f32 %v731_v10, %v5134_v8 }
 0x15c   :  { %v929_v43 = vsel %vm858_vm4, %v819_v62, 0.0 }
 0x15d   :  { %v1301_v63 = vunpack.c.l.b16 %v1086_v55  ;;  %v1302_v9 = vunpack.c.l.b16 %v1087_v48  ;;  %v895_v22 = vadd.f32 %v894_v5, %v893_v30  ;;  %v921_v39 = vadd.f32 %v818_v38, %v815_v59  ;;  %v329_v51 = vpop.permute.xlu1 %328  ;;  %v5436_v53 = vpop.permute.xlu0 %336  ;;  %v4260_v5 = vld [vmem:[%s6462_s0 + $0xe8] sm:$0xff] }
 0x15e   :  { %v930_v54 = vadd.f32 %v929_v43, %v928_v6  ;;  %v5440_v23 = vsel %vm358_vm2, %v329_v51, %v5336_v45  ;;  %v465_v48 = vadd.f32 %v5248_v32, %v108_v42  ;;  %v5491_v38 = vld [vmem:[%s6461_s1 + $0x28] sm:$0xff]  ;;  %v4264_v43 = vld [vmem:[%s6462_s0 + $0xe0] sm:$0xff] }
 0x15f   :  { %v896_v8 = vrot.slane %v895_v22, 1  ;;  %v922_v33 = vrot.slane %v921_v39, 4  ;;  %v5444_v20 = vsel %vm1320_vm6, %v1301_v63, %v5384_v37  ;;  %v5448_v34 = vsel %vm1320_vm6, %v1302_v9, %v5378_v40  ;;  %v5501_v32 = vld [vmem:[%s6461_s1 + $0x8] sm:$0xff]  ;;  %v5510_v63 = vld [vmem:[%s6461_s1 + $0x20] sm:$0xff] }
 0x160   :  { %v931_v17 = vrot.slane %v930_v54, 4  ;;  %v110_v9 = vmul.f32 %v5510_v63, %v4264_v43 }
 0x161   :  { %v897_v0 = vadd.f32 %v896_v8, %v895_v22  ;;  %v923_v46 = vadd.f32 %v922_v33, %v921_v39  ;;  %v5450_v3 = vpop.permute.xlu1 %338  ;;  %v5452_v36 = vpop.permute.xlu0 %342 }
 0x162   :  { %v932_v2 = vadd.f32 %v931_v17, %v930_v54  ;;  %v5457_v45 = vsel %vm358_vm2, %v5436_v53, %v5450_v3 }
 0x163   :  { %v1037_v37 = vadd.f32 %v5244_v24, %v897_v0  ;;  %v924_v15 = vrot.slane %v923_v46, 2 }
 0x164   :  { %v933_v21 = vrot.slane %v932_v2, 2 }
 0x165   :  { %v1061_v52 = vmax.f32 %v1037_v37, 0.0  ;;  %v925_v25 = vadd.f32 %v924_v15, %v923_v46  ;;  %v5460_v40 = vpop.permute.xlu1 %344  ;;  %v656_v4 = vpop.permute.xlu0 %655 }
 0x166   :  { %v934_v50 = vadd.f32 %v933_v21, %v932_v2  ;;  %v728_v7 = vsel %vm715_vm3, %v656_v4, %v5386_v14  ;;  %v467_v21 = vadd.f32 %v5280_v49, %v110_v9  ;;  %v4266_v9 = vld [vmem:[%s6462_s0 + $0xc0] sm:$0xff] }
 0x167   :  { %v1085_v61 = vpack.c.bf16 %v1061_v52, %v1061_v52  ;;  %v926_v31 = vrot.slane %v925_v25, 1  ;;  %v814_v59 = vadd.f32 %v728_v7, %v5073_v13 }
 0x168   :  { %v935_v58 = vrot.slane %v934_v50, 1 }
 0x169   :  { %v1300_v29 = vunpack.c.l.b16 %v1085_v61  ;;  %v927_v30 = vadd.f32 %v926_v31, %v925_v25  ;;  %v662_v1 = vpop.permute.xlu1 %661  ;;  %v5474_v14 = vpop.permute.xlu0 %669 }
 0x16a   :  { %v936_v41 = vadd.f32 %v935_v58, %v934_v50  ;;  %v730_v13 = vsel %vm715_vm3, %v662_v1, %v5403_v19  ;;  %v111_v19 = vmul.f32 %v5491_v38, %v4260_v5 }
 0x16b   :  { %v1041_v10 = vadd.f32 %v5244_v24, %v927_v30  ;;  %v817_v62 = vadd.f32 %v730_v13, %v5107_v28  ;;  %v5482_v55 = vsel %vm1320_vm6, %v1300_v29, %v5356_v57  ;;  %v4262_v28 = vld [vmem:[%s6462_s0 + $0xc8] sm:$0xff] }
 0x16c   :  { %v1042_v6 = vadd.f32 %v5244_v24, %v936_v41  ;;  %v107_v57 = vmul.f32 %v5501_v32, %v4262_v28  ;;  %v468_v46 = vadd.f32 %v5271_v47, %v111_v19 }
 0x16d   :  { %v1065_v22 = vmax.f32 %v1041_v10, 0.0  ;;  %v914_v39 = vadd.f32 %v817_v62, %v814_v59  ;;  %v672_v51 = vpop.permute.xlu1 %671  ;;  %v5513_v54 = vpop.permute.xlu0 %675 }
 0x16e   :  { %v1066_v8 = vmax.f32 %v1042_v6, 0.0  ;;  %v822_v33 = vadd.f32 %v672_v51, %v465_v48  ;;  %v733_v37 = vsel %vm715_vm3, %v5474_v14, %v672_v51  ;;  %v464_v15 = vadd.f32 %v5255_v16, %v107_v57  ;;  %v4268_v51 = vld [vmem:[%s6462_s0 + $0xd8] sm:$0xff] }
 0x16f   :  { %v1089_v17 = vpack.c.bf16 %v1065_v22, %v1065_v22  ;;  %v915_v0 = vrot.slane %v914_v39, 4  ;;  %v5549_v22 = vld [vmem:[%s6461_s1] sm:$0xff] }
 0x170   :  { %v1090_v2 = vpack.c.bf16 %v1066_v8, %v1066_v8  ;;  %v821_v59 = vadd.f32 %v733_v37, %v464_v15  ;;  %v951_v16 = vsel %vm858_vm4, %v822_v33, 0.0  ;;  %v5558_v8 = vld [vmem:[%s6461_s1 + $0x18] sm:$0xff] }
 0x171   :  { %v1304_v52 = vunpack.c.l.b16 %v1089_v17  ;;  %v916_v25 = vadd.f32 %v915_v0, %v914_v39  ;;  %v678_v4 = vpop.permute.xlu1 %677  ;;  %v5520_v50 = vpop.permute.xlu0 %334  ;;  %v106_v39 = vmul.f32 %v5549_v22, %v4266_v9  ;;  %v109_v33 = vmul.f32 %v5558_v8, %v4268_v51 }
 0x172   :  { %v1305_v7 = vunpack.c.l.b16 %v1090_v2  ;;  %v735_v61 = vsel %vm715_vm3, %v5513_v54, %v678_v4  ;;  %v825_v31 = vadd.f32 %v678_v4, %v468_v46 }
 0x173   :  { %v917_v47 = vrot.slane %v916_v25, 2  ;;  %v824_v18 = vadd.f32 %v735_v61, %v467_v21  ;;  %v5526_v42 = vsel %vm1322_vm7, %v1304_v52, %v5444_v20  ;;  %v463_v4 = vadd.f32 %v5231_v27, %v106_v39  ;;  %v4274_v39 = vld [vmem:[%s6462_s0 + $0xf0] sm:$0xff] }
 0x174   :  { %v952_v49 = vsel %vm858_vm4, %v825_v31, 0.0  ;;  %v5532_v58 = vsel %vm1322_vm7, %v1305_v7, %v5448_v34  ;;  %v466_v7 = vadd.f32 %v5266_v26, %v109_v33  ;;  %v112_v51 = vmul.f32 %v4274_v39, %v5549_v22  ;;  %v4275_v33 = vld [vmem:[%s6462_s0 + $0x108] sm:$0xff] }
 0x175   :  { %v918_v29 = vadd.f32 %v917_v47, %v916_v25  ;;  %v944_v30 = vadd.f32 %v824_v18, %v821_v59  ;;  %v953_v1 = vadd.f32 %v952_v49, %v951_v16  ;;  %v5534_v41 = vpop.permute.xlu1 %340  ;;  %v5536_v13 = vpop.permute.xlu0 %348  ;;  %v4270_v16 = vld [vmem:[%s6462_s0 + $0x100] sm:$0xff] }
 0x176   :  { %v114_v49 = vmul.f32 %v4270_v16, %v5471_v11 }
 0x177   :  { %v919_v10 = vrot.slane %v918_v29, 1  ;;  %v945_v62 = vrot.slane %v944_v30, 4  ;;  %v954_v48 = vrot.slane %v953_v1, 4 }
 0x178   :  { %v471_v9 = vadd.f32 %v5334_v44, %v114_v49  ;;  %v4277_v49 = vld [vmem:[%s6462_s0 + $0x130] sm:$0xff] }
 0x179   :  { %v920_v20 = vadd.f32 %v919_v10, %v918_v29  ;;  %v946_v5 = vadd.f32 %v945_v62, %v944_v30  ;;  %v955_v19 = vadd.f32 %v954_v48, %v953_v1  ;;  %v5538_v6 = vpop.permute.xlu1 %350  ;;  %v5540_v28 = vpop.permute.xlu0 %354  ;;  %v4271_v10 = vld [vmem:[%s6462_s0 + $0xf8] sm:$0xff] }
 0x17a   :  { %v113_v62 = vmul.f32 %v4271_v10, %v5501_v32  ;;  %v4272_v48 = vld [vmem:[%s6462_s0 + $0x118] sm:$0xff] }
 0x17b   :  { %v1040_v34 = vadd.f32 %v5244_v24, %v920_v20  ;;  %v947_v57 = vrot.slane %v946_v5, 2  ;;  %v956_v43 = vrot.slane %v955_v19, 2  ;;  %v4273_v20 = vld [vmem:[%s6462_s0 + $0x110] sm:$0xff] }
 0x17d   :  { %v1064_v17 = vmax.f32 %v1040_v34, 0.0  ;;  %v948_v0 = vadd.f32 %v947_v57, %v946_v5  ;;  %v957_v46 = vadd.f32 %v956_v43, %v955_v19  ;;  %v5561_v2 = vpop.permute.xlu1 %356  ;;  %v668_v37 = vpop.permute.xlu0 %667  ;;  %v116_v5 = vmul.f32 %v4273_v20, %v5510_v63 }
 0x17e   :  { %v732_v25 = vsel %vm715_vm3, %v668_v37, %v5474_v14 }
 0x17f   :  { %v1088_v15 = vpack.c.bf16 %v1064_v17, %v1064_v17  ;;  %v949_v21 = vrot.slane %v948_v0, 1  ;;  %v958_v52 = vrot.slane %v957_v46, 1  ;;  %v820_v29 = vadd.f32 %v732_v25, %v463_v4 }
 0x180   :  { %v115_v17 = vmul.f32 %v4275_v33, %v5558_v8  ;;  %v4281_v33 = vld [vmem:[%s6462_s0 + $0x138] sm:$0xff] }
 0x181   :  { %v1303_v61 = vunpack.c.l.b16 %v1088_v15  ;;  %v950_v31 = vadd.f32 %v949_v21, %v948_v0  ;;  %v959_v47 = vadd.f32 %v958_v52, %v957_v46  ;;  %v674_v59 = vpop.permute.xlu1 %673  ;;  %v5567_v18 = vpop.permute.xlu0 %681  ;;  %v4276_v0 = vld [vmem:[%s6462_s0 + $0x128] sm:$0xff]  ;;  %v470_v21 = vadd.f32 %v5344_v12, %v113_v62 }
 0x182   :  { %v734_v14 = vsel %vm715_vm3, %v674_v59, %v5513_v54  ;;  %v117_v54 = vmul.f32 %v4272_v48, %v5491_v38  ;;  %v5608_v46 = vmul.f32 %v4276_v0, %v5501_v32  ;;  %v120_v12 = vmul.f32 %v4277_v49, %v5471_v11  ;;  %v4279_v62 = vld [vmem:[%s6462_s0 + $0x148] sm:$0xff] }
 0x183   :  { %v1044_v27 = vadd.f32 %v5244_v24, %v950_v31  ;;  %v1045_v26 = vadd.f32 %v5244_v24, %v959_v47  ;;  %v823_v30 = vadd.f32 %v734_v14, %v466_v7  ;;  %v5579_v1 = vsel %vm1322_vm7, %v1303_v61, %v5482_v55 }
 0x184   :  { %v474_v52 = vadd.f32 %v5358_v60, %v117_v54  ;;  %v473_v7 = vadd.f32 %v5366_v35, %v116_v5  ;;  %v4278_v60 = vld [vmem:[%s6462_s0 + $0x140] sm:$0xff]  ;;  %v123_v48 = vmul.f32 %v4279_v62, %v5491_v38  ;;  %v121_v0 = vmul.f32 %v4281_v33, %v5558_v8 }
 0x185   :  { %v1068_v55 = vmax.f32 %v1044_v27, 0.0  ;;  %v1069_v19 = vmax.f32 %v1045_v26, 0.0  ;;  %v937_v34 = vadd.f32 %v823_v30, %v820_v29  ;;  %v684_v57 = vpop.permute.xlu1 %683  ;;  %v5593_v43 = vpop.permute.xlu0 %687  ;;  %v122_v29 = vmul.f32 %v4278_v60, %v5510_v63 }
 0x186   :  { %v737_v25 = vsel %vm715_vm3, %v5567_v18, %v684_v57  ;;  %v828_v4 = vadd.f32 %v684_v57, %v471_v9  ;;  %v476_v62 = vadd.f32 %v5457_v45, %v5608_v46  ;;  %v480_v33 = vadd.f32 %v5460_v40, %v123_v48 }
 0x187   :  { %v1092_v44 = vpack.c.bf16 %v1068_v55, %v1068_v55  ;;  %v1093_v37 = vpack.c.bf16 %v1069_v19, %v1069_v19  ;;  %v938_v15 = vrot.slane %v937_v34, 4  ;;  %v827_v26 = vadd.f32 %v737_v25, %v470_v21  ;;  %v4280_v55 = vld [vmem:[%s6462_s0 + $0x120] sm:$0xff]  ;;  %v4284_v21 = vld [vmem:[%s6462_s0 + $0x170] sm:$0xff] }
 0x188   :  { %v974_v54 = vsel %vm858_vm4, %v828_v4, 0.0 }
 0x189   :  { %v1307_v61 = vunpack.c.l.b16 %v1092_v44  ;;  %v1308_v31 = vunpack.c.l.b16 %v1093_v37  ;;  %v939_v47 = vadd.f32 %v938_v15, %v937_v34  ;;  %v690_v59 = vpop.permute.xlu1 %689  ;;  %v5615_v16 = vpop.permute.xlu0 %346  ;;  %v4283_v37 = vld [vmem:[%s6462_s0 + $0x160] sm:$0xff] }
 0x18a   :  { %v739_v35 = vsel %vm715_vm3, %v5593_v43, %v690_v59  ;;  %v831_v14 = vadd.f32 %v690_v59, %v474_v52  ;;  %v126_v15 = vmul.f32 %v4283_v37, %v5471_v11  ;;  %v5663_v52 = vmul.f32 %v4284_v21, %v5510_v63  ;;  %v4286_v63 = vld [vmem:[%s6462_s0 + $0x150] sm:$0xff] }
 0x18b   :  { %v940_v27 = vrot.slane %v939_v47, 2  ;;  %v830_v30 = vadd.f32 %v739_v35, %v473_v7  ;;  %v5629_v10 = vsel %vm1324_vm8, %v1307_v61, %v5526_v42  ;;  %v5639_v5 = vsel %vm1324_vm8, %v1308_v31, %v5532_v58  ;;  %v4282_v58 = vld [vmem:[%s6462_s0 + $0x158] sm:$0xff] }
 0x18c   :  { %v975_v20 = vsel %vm858_vm4, %v831_v14, 0.0  ;;  %v118_v42 = vmul.f32 %v4280_v55, %v5549_v22  ;;  %v125_v44 = vmul.f32 %v4282_v58, %v5501_v32  ;;  %v469_v32 = vadd.f32 %v5431_v56, %v112_v51  ;;  %v4285_v31 = vld [vmem:[%s6462_s0 + $0x178] sm:$0xff] }
 0x18d   :  { %v941_v19 = vadd.f32 %v940_v27, %v939_v47  ;;  %v967_v34 = vadd.f32 %v830_v30, %v827_v26  ;;  %v976_v57 = vadd.f32 %v975_v20, %v974_v54  ;;  %v5645_v9 = vpop.permute.xlu1 %352  ;;  %v680_v39 = vpop.permute.xlu0 %679  ;;  %v5672_v11 = vmul.f32 %v4285_v31, %v5491_v38 }
 0x18e   :  { %v736_v61 = vsel %vm715_vm3, %v680_v39, %v5567_v18  ;;  %v5678_v47 = vmul.f32 %v4286_v63, %v5549_v22  ;;  %v4287_v18 = vld [vmem:[%s6462_s0 + $0x168] sm:$0xff]  ;;  %v472_v51 = vadd.f32 %v5440_v23, %v115_v17  ;;  %v386_v14 = vsel %vm358_vm2, %v5452_v36, %v5460_v40 }
 0x18f   :  { %v942_v25 = vrot.slane %v941_v19, 1  ;;  %v968_v4 = vrot.slane %v967_v34, 4  ;;  %v977_v7 = vrot.slane %v976_v57, 4  ;;  %v5684_v56 = vmul.f32 %v4287_v18, %v5558_v8 }
 0x190   :  { %v383_v22 = vsel %vm358_vm2, %v5520_v50, %v5436_v53  ;;  %v826_v27 = vadd.f32 %v736_v61, %v469_v32  ;;  %v477_v54 = vadd.f32 %v5450_v3, %v120_v12  ;;  %v385_v20 = vsel %vm358_vm2, %v5534_v41, %v5452_v36 }
 0x191   :  { %v943_v59 = vadd.f32 %v942_v25, %v941_v19  ;;  %v969_v49 = vadd.f32 %v968_v4, %v967_v34  ;;  %v978_v38 = vadd.f32 %v977_v7, %v976_v57  ;;  %v686_v60 = vpop.permute.xlu1 %685  ;;  %v694_v35 = vpop.permute.xlu0 %693  ;;  %v388_v53 = vsel %vm358_vm2, %v5536_v13, %v5538_v6 }
 0x192   :  { %v738_v8 = vsel %vm715_vm3, %v686_v60, %v5593_v43  ;;  %v479_v39 = vadd.f32 %v386_v14, %v122_v29  ;;  %v475_v45 = vadd.f32 %v383_v22, %v118_v42  ;;  %v478_v41 = vadd.f32 %v385_v20, %v121_v0 }
 0x193   :  { %v1043_v26 = vadd.f32 %v5244_v24, %v943_v59  ;;  %v970_v23 = vrot.slane %v969_v49, 2  ;;  %v979_v17 = vrot.slane %v978_v38, 2  ;;  %v829_v30 = vadd.f32 %v738_v8, %v472_v51 }
 0x194   :  { %v5707_v37 = vadd.f32 %v388_v53, %v125_v44  ;;  %v483_v21 = vadd.f32 %v5538_v6, %v126_v15  ;;  %v390_v15 = vsel %vm358_vm2, %v5540_v28, %v5561_v2  ;;  %v387_v8 = vsel %vm358_vm2, %v5615_v16, %v5536_v13 }
 0x195   :  { %v1067_v50 = vmax.f32 %v1043_v26, 0.0  ;;  %v971_v43 = vadd.f32 %v970_v23, %v969_v49  ;;  %v980_v55 = vadd.f32 %v979_v17, %v978_v38  ;;  %v960_v19 = vadd.f32 %v829_v30, %v826_v27  ;;  %v696_v34 = vpop.permute.xlu1 %695  ;;  %v700_v57 = vpop.permute.xlu0 %699 }
 0x196   :  { %v741_v3 = vsel %vm715_vm3, %v694_v35, %v696_v34  ;;  %v834_v25 = vadd.f32 %v696_v34, %v477_v54  ;;  %v486_v53 = vadd.f32 %v5561_v2, %v5672_v11 }
 0x197   :  { %v1091_v46 = vpack.c.bf16 %v1067_v50, %v1067_v50  ;;  %v972_v12 = vrot.slane %v971_v43, 1  ;;  %v981_v58 = vrot.slane %v980_v55, 1  ;;  %v961_v36 = vrot.slane %v960_v19, 4 }
 0x198   :  { %v833_v40 = vadd.f32 %v741_v3, %v476_v62  ;;  %v997_v51 = vsel %vm858_vm4, %v834_v25, 0.0 }
 0x199   :  { %v1306_v4 = vunpack.c.l.b16 %v1091_v46  ;;  %v973_v7 = vadd.f32 %v972_v12, %v971_v43  ;;  %v982_v61 = vadd.f32 %v981_v58, %v980_v55  ;;  %v962_v32 = vadd.f32 %v961_v36, %v960_v19  ;;  %v702_v29 = vpop.permute.xlu1 %701  ;;  %v692_v31 = vpop.permute.xlu0 %691 }
 0x19a   :  { %v743_v48 = vsel %vm715_vm3, %v700_v57, %v702_v29  ;;  %v837_v42 = vadd.f32 %v702_v29, %v480_v33  ;;  %v740_v63 = vsel %vm715_vm3, %v692_v31, %v694_v35  ;;  %v481_v33 = vadd.f32 %v387_v8, %v5678_v47 }
 0x19b   :  { %v1047_v0 = vadd.f32 %v5244_v24, %v973_v7  ;;  %v1048_v44 = vadd.f32 %v5244_v24, %v982_v61  ;;  %v963_v18 = vrot.slane %v962_v32, 2  ;;  %v836_v6 = vadd.f32 %v743_v48, %v479_v39 }
 0x19c   :  { %v998_v59 = vsel %vm858_vm4, %v837_v42, 0.0  ;;  %v5721_v49 = vsel %vm1324_vm8, %v1306_v4, %v5579_v1  ;;  %v832_v23 = vadd.f32 %v740_v63, %v475_v45  ;;  %v485_v1 = vadd.f32 %v390_v15, %v5663_v52 }
 0x19d   :  { %v1071_v38 = vmax.f32 %v1047_v0, 0.0  ;;  %v1072_v60 = vmax.f32 %v1048_v44, 0.0  ;;  %v964_v35 = vadd.f32 %v963_v18, %v962_v32  ;;  %v990_v14 = vadd.f32 %v836_v6, %v833_v40  ;;  %v698_v22 = vpop.permute.xlu1 %697  ;;  %v706_v27 = vpop.permute.xlu0 %705 }
 0x19e   :  { %v999_v26 = vadd.f32 %v998_v59, %v997_v51  ;;  %v742_v17 = vsel %vm715_vm3, %v698_v22, %v700_v57  ;;  %v389_v57 = vsel %vm358_vm2, %v5645_v9, %v5540_v28 }
 0x19f   :  { %v1096_v30 = vpack.c.bf16 %v1072_v60, %v1072_v60  ;;  %v965_v62 = vrot.slane %v964_v35, 1  ;;  %v991_v54 = vrot.slane %v990_v14, 4  ;;  %v835_v20 = vadd.f32 %v742_v17, %v478_v41 }
 0x1a0   :  { %v1000_v50 = vrot.slane %v999_v26, 4  ;;  %v1095_v43 = vpack.c.bf16 %v1071_v38, %v1071_v38  ;;  %v484_v41 = vadd.f32 %v389_v57, %v5684_v56 }
 0x1a1   :  { %v1311_v55 = vunpack.c.l.b16 %v1096_v30  ;;  %v966_v19 = vadd.f32 %v965_v62, %v964_v35  ;;  %v992_v34 = vadd.f32 %v991_v54, %v990_v14  ;;  %v983_v39 = vadd.f32 %v835_v20, %v832_v23  ;;  %v708_v13 = vpop.permute.xlu1 %707  ;;  %v712_v16 = vpop.permute.xlu0 %711 }
 0x1a2   :  { %v1001_v45 = vadd.f32 %v1000_v50, %v999_v26  ;;  %v1310_v3 = vunpack.c.l.b16 %v1095_v43  ;;  %v745_v11 = vsel %vm715_vm3, %v706_v27, %v708_v13  ;;  %v840_v58 = vadd.f32 %v708_v13, %v483_v21 }
 0x1a3   :  { %v1046_v52 = vadd.f32 %v5244_v24, %v966_v19  ;;  %v993_v46 = vrot.slane %v992_v34, 2  ;;  %v984_v2 = vrot.slane %v983_v39, 4  ;;  %v1343_v47 = vsel %vm1326_vm9, %v1311_v55, %v5639_v5 }
 0x1a4   :  { %v1002_v12 = vrot.slane %v1001_v45, 2  ;;  %v1336_v36 = vsel %vm1326_vm9, %v1310_v3, %v5629_v10  ;;  %v839_v32 = vadd.f32 %v745_v11, %v5707_v37  ;;  %v1020_v5 = vsel %vm858_vm4, %v840_v58, 0.0 }
 0x1a5   :  { %v1070_v25 = vmax.f32 %v1046_v52, 0.0  ;;  %v994_v28 = vadd.f32 %v993_v46, %v992_v34  ;;  %v985_v9 = vadd.f32 %v984_v2, %v983_v39  ;;  %v714_v4 = vpop.permute.xlu1 %713  ;;  %v704_v7 = vpop.permute.xlu0 %703 }
 0x1a6   :  { %v1003_v61 = vadd.f32 %v1002_v12, %v1001_v45  ;;  %v747_v29 = vsel %vm715_vm3, %v712_v16, %v714_v4  ;;  %v843_v31 = vadd.f32 %v714_v4, %v486_v53  ;;  %v744_v10 = vsel %vm715_vm3, %v704_v7, %v706_v27 }
 0x1a7   :  { %v995_v21 = vrot.slane %v994_v28, 1  ;;  %v986_v40 = vrot.slane %v985_v9, 2  ;;  %v842_v48 = vadd.f32 %v747_v29, %v485_v1  ;;  %v1094_v63 = vpack.c.bf16 %v1070_v25, %v1070_v25 }
 0x1a8   :  { %v1004_v42 = vrot.slane %v1003_v61, 1  ;;  %v1021_v56 = vsel %vm858_vm4, %v843_v31, 0.0  ;;  %v838_v51 = vadd.f32 %v744_v10, %v481_v33 }
 0x1a9   :  { %v996_v0 = vadd.f32 %v995_v21, %v994_v28  ;;  %v987_v44 = vadd.f32 %v986_v40, %v985_v9  ;;  %v1013_v18 = vadd.f32 %v842_v48, %v839_v32  ;;  %v1022_v6 = vadd.f32 %v1021_v56, %v1020_v5  ;;  %v710_v15 = vpop.permute.xlu1 %709 }
 0x1aa   :  { %v1005_v37 = vadd.f32 %v1004_v42, %v1003_v61  ;;  %v746_v59 = vsel %vm715_vm3, %v710_v15, %v712_v16  ;;  %v1309_v38 = vunpack.c.l.b16 %v1094_v63  ;;  %v3958_v63 = vld [vmem:[%s6463_s3 + $0x300] ss:$24 sps:$4 sm:$0xff]   ;;  %v3964_v15 = vld [vmem:[%s6463_s3 + $0x330] ss:$24 sps:$4 sm:$0xff]  }
 0x1ab   :  { %v988_v60 = vrot.slane %v987_v44, 1  ;;  %v1014_v35 = vrot.slane %v1013_v18, 4  ;;  %v1023_v14 = vrot.slane %v1022_v6, 4  ;;  %v841_v22 = vadd.f32 %v746_v59, %v484_v41  ;;  %v3975_v59 = vld [vmem:[%s6463_s3 + $0x36c] ss:$24 sps:$4 sm:$0xff]  }
 0x1ac   :  { %v1051_v27 = vadd.f32 %v5244_v24, %v1005_v37  ;;  %v1050_v8 = vadd.f32 %v5244_v24, %v996_v0  ;;  %v1327_v26 = vsel %vm1326_vm9, %v1309_v38, %v5721_v49  ;;  %v3967_v37 = vld [vmem:[%s6463_s3 + $0x338] ss:$24 sps:$4 sm:$0xff]   ;;  %v4292_v38 = vmov 0  }
 0x1ad   :  { %v989_v23 = vadd.f32 %v988_v60, %v987_v44  ;;  %v1015_v17 = vadd.f32 %v1014_v35, %v1013_v18  ;;  %v1024_v30 = vadd.f32 %v1023_v14, %v1022_v6  ;;  %v1006_v62 = vadd.f32 %v841_v22, %v838_v51  ;;  %v3966_v44 = vld [vmem:[%s6463_s3 + $0x334] ss:$24 sps:$4 sm:$0xff]   ;;  %v3972_v51 = vld [vmem:[%s6463_s3 + $0x364] ss:$24 sps:$4 sm:$0xff]   ;;  %v3970_v60 = vld [vmem:[%s6463_s3 + $0x360] ss:$24 sps:$4 sm:$0xff]  }
 0x1ae   :  { %v1075_v54 = vmax.f32 %v1051_v27, 0.0  ;;  %v1074_v20 = vmax.f32 %v1050_v8, 0.0  ;;  %v3969_v6 = vld [vmem:[%s6463_s3 + $0x33c] ss:$24 sps:$4 sm:$0xff]   ;;  %v3973_v35 = vld [vmem:[%s6463_s3 + $0x368] ss:$24 sps:$4 sm:$0xff]  }
 0x1af   :  { %v1016_v1 = vrot.slane %v1015_v17, 2  ;;  %v1025_v53 = vrot.slane %v1024_v30, 2  ;;  %v1007_v50 = vrot.slane %v1006_v62, 4  ;;  %v1049_v43 = vadd.f32 %v5244_v24, %v989_v23  ;;  %v3978_v14 = vld [vmem:[%s6463_s3 + $0x394] ss:$24 sps:$4 sm:$0xff]  }
 0x1b0   :  { %v1099_v55 = vpack.c.bf16 %v1075_v54, %v1075_v54  ;;  %v1098_v19 = vpack.c.bf16 %v1074_v20, %v1074_v20  ;;  %v3981_v22 = vld [vmem:[%s6463_s3 + $0x39c] ss:$24 sps:$4 sm:$0xff]   ;;  %v3976_v27 = vld [vmem:[%s6463_s3 + $0x390] ss:$24 sps:$4 sm:$0xff]   ;;  %v3987_v23 = vld [vmem:[%s6463_s3 + $0x3cc] ss:$24 sps:$4 sm:$0xff]  }
 0x1b1   :  { %v1017_v34 = vadd.f32 %v1016_v1, %v1015_v17  ;;  %v1026_v39 = vadd.f32 %v1025_v53, %v1024_v30  ;;  %v1008_v13 = vadd.f32 %v1007_v50, %v1006_v62  ;;  %v1073_v16 = vmax.f32 %v1049_v43, 0.0  ;;  %v3979_v8 = vld [vmem:[%s6463_s3 + $0x398] ss:$24 sps:$4 sm:$0xff]   ;;  %v3985_v30 = vld [vmem:[%s6463_s3 + $0x3c8] ss:$24 sps:$4 sm:$0xff]  }
 0x1b2   :  { %v1314_v33 = vunpack.c.l.b16 %v1099_v55  ;;  %v1313_v49 = vunpack.c.l.b16 %v1098_v19  ;;  %v3982_v17 = vld [vmem:[%s6463_s3 + $0x3c0] ss:$24 sps:$4 sm:$0xff]   ;;  %v3990_v62 = vld [vmem:[%s6463_s3 + $0x3f4] ss:$24 sps:$4 sm:$0xff]   ;;  %v3988_v53 = vld [vmem:[%s6463_s3 + $0x3f0] ss:$24 sps:$4 sm:$0xff]  }
 0x1b3   :  { %v1018_v57 = vrot.slane %v1017_v34, 1  ;;  %v1027_v45 = vrot.slane %v1026_v39, 1  ;;  %v1009_v3 = vrot.slane %v1008_v13, 2  ;;  %v1097_v52 = vpack.c.bf16 %v1073_v16, %v1073_v16  ;;  %v3993_v54 = vld [vmem:[%s6463_s3 + $0x3fc] ss:$24 sps:$4 sm:$0xff]   ;;  %v1235_v20 = vld [vmem:[%s6463_s3 + $0x420] sm:$0xff] }
 0x1b4   :  { %v1337_v46 = vsel %vm1328_vm10, %v1313_v49, %v1336_v36  ;;  %v1344_v2 = vsel %vm1328_vm10, %v1314_v33, %v1343_v47  ;;  %v1236_v1 = vld [vmem:[%s6463_s3 + $0x428] sm:$0xff]  ;;  %v3991_v50 = vld [vmem:[%s6463_s3 + $0x3f8] ss:$24 sps:$4 sm:$0xff]   ;;  %v3636_v43 = vcombine.low %v1235_v20, %v1235_v20  ;;  %v3637_v19 = vcombine.high %v1235_v20, %v1235_v20  ;;  %v4039_v20 = vld [vmem:[%s6463_s3 + $0x284] ss:$24 sps:$4 sm:$0xff]  }
 0x1b5   :  { %v1019_v11 = vadd.f32 %v1018_v57, %v1017_v34  ;;  %v1028_v12 = vadd.f32 %v1027_v45, %v1026_v39  ;;  %v1010_v58 = vadd.f32 %v1009_v3, %v1008_v13  ;;  %v1312_v41 = vunpack.c.l.b16 %v1097_v52  ;;  %v4000_v16 = vld [vmem:[%s6463_s3 + $0x14] ss:$24 sps:$4 sm:$0xff]   ;;  %v4068_v33 = vld [vmem:[%s6465_s5 + $0x4] ss:$12 sps:$4 sm:$0xff]   ;;  %v4071_v3 = vld [vmem:[%s6465_s5 + $0x1c] ss:$12 sps:$4 sm:$0xff]  }
 0x1b6   :  { %v3638_v55 = vcombine.low %v1236_v1, %v1236_v1  ;;  %v3639_v34 = vcombine.high %v1236_v1, %v1236_v1  ;;  %v2031_v39 = vsel %vm2029_vm12, %v3636_v43, 0  ;;  %v3998_v49 = vld [vmem:[%s6463_s3 + $0x10] ss:$24 sps:$4 sm:$0xff]   ;;  %v4003_v57 = vld [vmem:[%s6463_s3 + $0x44] ss:$24 sps:$4 sm:$0xff]  }
 0x1b7   :  { %v1054_v25 = vadd.f32 %v5244_v24, %v1028_v12  ;;  %v1011_v28 = vrot.slane %v1010_v58, 1  ;;  %v1053_v9 = vadd.f32 %v5244_v24, %v1019_v11  ;;  %v1329_v4 = vsel %vm1328_vm10, %v1312_v41, %v1327_v26  ;;  %v3984_v26 = vld [vmem:[%s6463_s3 + $0x3c4] ss:$24 sps:$4 sm:$0xff]   ;;  %v4066_v45 = vld [vmem:[%s6465_s5] ss:$12 sps:$4 sm:$0xff]  }
 0x1b8   :  { %v2037_v13 = vsel %vm2029_vm12, %v3638_v55, 0  ;;  %v4069_v11 = vld [vmem:[%s6465_s5 + $0x18] ss:$12 sps:$4 sm:$0xff]   ;;  %v4074_v12 = vld [vmem:[%s6465_s5 + $0x34] ss:$12 sps:$4 sm:$0xff]  }
 0x1b9   :  { %v1078_v7 = vmax.f32 %v1054_v25, 0.0  ;;  %v1012_v61 = vadd.f32 %v1011_v28, %v1010_v58  ;;  %v1077_v32 = vmax.f32 %v1053_v9, 0.0  ;;  %v4004_v58 = vld [vmem:[%s6463_s3 + $0x70] ss:$24 sps:$4 sm:$0xff]   ;;  %v4009_v41 = vld [vmem:[%s6463_s3 + $0xa4] ss:$24 sps:$4 sm:$0xff]  }
 0x1ba   :  { %v4072_v25 = vld [vmem:[%s6465_s5 + $0x30] ss:$12 sps:$4 sm:$0xff]   ;;  %v4077_v28 = vld [vmem:[%s6465_s5 + $0x4c] ss:$12 sps:$4 sm:$0xff]  }
 0x1bb   :  { %v1101_v29 = vpack.c.bf16 %v1077_v32, %v1077_v32  ;;  %v1102_v31 = vpack.c.bf16 %v1078_v7, %v1078_v7  ;;  %v1052_v36 = vadd.f32 %v5244_v24, %v1012_v61  ;;  %v3961_v24 = vld [vmem:[%s6463_s3 + $0x308] ss:$24 sps:$4 sm:$0xff]   ;;  %v4080_v61 = vld [vmem:[%s6465_s5 + $0x64] ss:$12 sps:$4 sm:$0xff]   ;;  %v4042_v43 = vld [vmem:[%s6463_s3 + $0x2b4] ss:$24 sps:$4 sm:$0xff]  }
 0x1bc   :  { %v4007_v9 = vld [vmem:[%s6463_s3 + $0xa0] ss:$24 sps:$4 sm:$0xff]   ;;  %v4075_v7 = vld [vmem:[%s6465_s5 + $0x48] ss:$12 sps:$4 sm:$0xff]  }
 0x1bd   :  { %v1316_v47 = vunpack.c.l.b16 %v1101_v29  ;;  %v1317_v21 = vunpack.c.l.b16 %v1102_v31  ;;  %v1076_v40 = vmax.f32 %v1052_v36, 0.0  ;;  %v4010_v32 = vld [vmem:[%s6463_s3 + $0xd0] ss:$24 sps:$4 sm:$0xff]   ;;  %v4015_v29 = vld [vmem:[%s6463_s3 + $0x104] ss:$24 sps:$4 sm:$0xff]  }
 0x1be   :  { %v4078_v31 = vld [vmem:[%s6465_s5 + $0x60] ss:$12 sps:$4 sm:$0xff]   ;;  %v4083_v36 = vld [vmem:[%s6465_s5 + $0x7c] ss:$12 sps:$4 sm:$0xff]   ;;  %v4115_v55 = vld [vmem:[%s6465_s5 + $0x138] ss:$12 sps:$4 sm:$0xff]  }
 0x1bf   :  { %v1338_v48 = vsel %vm1330_vm11, %v1316_v47, %v1337_v46  ;;  %v5758_v10 = vsel %vm1330_vm11, %v1317_v21, %v1344_v2  ;;  %v1100_v42 = vpack.c.bf16 %v1076_v40, %v1076_v40  ;;  %v4001_v46 = vld [vmem:[%s6463_s3 + $0x40] ss:$24 sps:$4 sm:$0xff]   ;;  %v4006_v2 = vld [vmem:[%s6463_s3 + $0x74] ss:$24 sps:$4 sm:$0xff]  }
 0x1c0   :  { %v5760_v5 = vpack.c.b16 %v1338_v48, %v1338_v48  ;;  %v5866_v52 = vpack.c.b16 %v5758_v10, %v5758_v10  ;;  %v4013_v47 = vld [vmem:[%s6463_s3 + $0x100] ss:$24 sps:$4 sm:$0xff]   ;;  %v4018_v21 = vld [vmem:[%s6463_s3 + $0x134] ss:$24 sps:$4 sm:$0xff]   ;;  %v4016_v10 = vld [vmem:[%s6463_s3 + $0x130] ss:$24 sps:$4 sm:$0xff]  }
 0x1c1   :  { %v1315_v56 = vunpack.c.l.b16 %v1100_v42  ;;  %v4081_v40 = vld [vmem:[%s6465_s5 + $0x78] ss:$12 sps:$4 sm:$0xff]   ;;  %v4086_v48 = vld [vmem:[%s6465_s5 + $0x94] ss:$12 sps:$4 sm:$0xff]  }
 0x1c2   :  { %2080 = vmatprep.mubr.bf16.mxu0 %v5760_v5  ;;  %2162 = vmatprep.mubr.bf16.mxu1 %v5760_v5  ;;  %v4021_v42 = vld [vmem:[%s6463_s3 + $0x164] ss:$24 sps:$4 sm:$0xff]   ;;  %v4110_v1 = vld [vmem:[%s6465_s5 + $0x120] ss:$12 sps:$4 sm:$0xff]  }
 0x1c3   :  { %v1331_v0 = vsel %vm1330_vm11, %v1315_v56, %v1329_v4  ;;  %v4012_v4 = vld [vmem:[%s6463_s3 + $0xd4] ss:$24 sps:$4 sm:$0xff]  }
 0x1c4   :  { %v5773_v18 = vpack.c.b16 %v1331_v0, %v1331_v0  ;;  %v4089_v56 = vld [vmem:[%s6465_s5 + $0xac] ss:$12 sps:$4 sm:$0xff]   ;;  %v4087_v0 = vld [vmem:[%s6465_s5 + $0xa8] ss:$12 sps:$4 sm:$0xff]  }
 0x1c6   :  { %2081 = vmatmul.mubr.bf16.vlgmr.msra.gmra.mrb[0].mxu0 %v5773_v18  ;;  %2163 = vmatmul.mubr.bf16.vlgmr.msra.gmra.mrb[0].mxu1 %v5773_v18 }
 0x1c7   :  { %2090 = vmatpush1.bf16.msra.mxu0 %v3958_v63  ;;  %2172 = vmatpush1.bf16.msra.mxu1 %v3961_v24  ;;  %v4019_v63 = vld [vmem:[%s6463_s3 + $0x160] ss:$24 sps:$4 sm:$0xff]   ;;  %v4024_v24 = vld [vmem:[%s6463_s3 + $0x194] ss:$24 sps:$4 sm:$0xff]  }
 0x1c8   :  { %2091 = vmatprep.subr.bf16.mxu0 %v3966_v44  ;;  %2173 = vmatprep.subr.bf16.mxu1 %v3969_v6  ;;  %v4092_v44 = vld [vmem:[%s6465_s5 + $0xc4] ss:$12 sps:$4 sm:$0xff]  }
 0x1c9   :  { %2121 = vmatprep.mubr.bf16.mxu0 %v4292_v38  ;;  %2203 = vmatprep.mubr.bf16.mxu1 %v4292_v38  ;;  %v4022_v6 = vld [vmem:[%s6463_s3 + $0x190] ss:$24 sps:$4 sm:$0xff]  }
 0x1cb   :  { %2092 = vmatpush1.bf16.msra.mxu0 %v3964_v15  ;;  %2174 = vmatpush1.bf16.msra.mxu1 %v3967_v37  ;;  %v4027_v15 = vld [vmem:[%s6463_s3 + $0x1c4] ss:$24 sps:$4 sm:$0xff]   ;;  %v4090_v37 = vld [vmem:[%s6465_s5 + $0xc0] ss:$12 sps:$4 sm:$0xff]  }
 0x1cc   :  { %2093 = vmatprep.subr.bf16.mxu0 %v3972_v51  ;;  %2175 = vmatprep.subr.bf16.mxu1 %v3975_v59  ;;  %v4097_v51 = vld [vmem:[%s6465_s5 + $0xdc] ss:$12 sps:$4 sm:$0xff]   ;;  %v4025_v59 = vld [vmem:[%s6463_s3 + $0x1c0] ss:$24 sps:$4 sm:$0xff]  }
 0x1cf   :  { %2094 = vmatpush1.bf16.msra.mxu0 %v3970_v60  ;;  %2176 = vmatpush1.bf16.msra.mxu1 %v3973_v35  ;;  %v4030_v60 = vld [vmem:[%s6463_s3 + $0x1f4] ss:$24 sps:$4 sm:$0xff]   ;;  %v4095_v35 = vld [vmem:[%s6465_s5 + $0xd8] ss:$12 sps:$4 sm:$0xff]  }
 0x1d0   :  { %2095 = vmatprep.subr.bf16.mxu0 %v3978_v14  ;;  %2177 = vmatprep.subr.bf16.mxu1 %v3981_v22  ;;  %v4102_v14 = vld [vmem:[%s6465_s5 + $0xf4] ss:$12 sps:$4 sm:$0xff]   ;;  %v4028_v22 = vld [vmem:[%s6463_s3 + $0x1f0] ss:$24 sps:$4 sm:$0xff]  }
 0x1d3   :  { %2096 = vmatpush1.bf16.msra.mxu0 %v3976_v27  ;;  %2178 = vmatpush1.bf16.msra.mxu1 %v3979_v8  ;;  %v4033_v27 = vld [vmem:[%s6463_s3 + $0x224] ss:$24 sps:$4 sm:$0xff]  }
 0x1d4   :  { %2097 = vmatprep.subr.bf16.mxu0 %v3984_v26  ;;  %2179 = vmatprep.subr.bf16.mxu1 %v3987_v23  ;;  %v4100_v8 = vld [vmem:[%s6465_s5 + $0xf0] ss:$12 sps:$4 sm:$0xff]   ;;  %v4107_v26 = vld [vmem:[%s6465_s5 + $0x10c] ss:$12 sps:$4 sm:$0xff]  }
 0x1d5   :  { %v4031_v23 = vld [vmem:[%s6463_s3 + $0x220] ss:$24 sps:$4 sm:$0xff]  }
 0x1d7   :  { %2098 = vmatpush1.bf16.msra.mxu0 %v3982_v17  ;;  %2180 = vmatpush1.bf16.msra.mxu1 %v3985_v30  ;;  %v4036_v17 = vld [vmem:[%s6463_s3 + $0x254] ss:$24 sps:$4 sm:$0xff]  }
 0x1d8   :  { %2099 = vmatprep.subr.bf16.mxu0 %v3990_v62  ;;  %2181 = vmatprep.subr.bf16.mxu1 %v3993_v54  ;;  %v4105_v30 = vld [vmem:[%s6465_s5 + $0x108] ss:$12 sps:$4 sm:$0xff]   ;;  %v4112_v62 = vld [vmem:[%s6465_s5 + $0x124] ss:$12 sps:$4 sm:$0xff]  }
 0x1d9   :  { %v4034_v54 = vld [vmem:[%s6463_s3 + $0x250] ss:$24 sps:$4 sm:$0xff]  }
 0x1db   :  { %2100 = vmatpush1.bf16.msra.mxu0 %v3988_v53  ;;  %2182 = vmatpush1.bf16.msra.mxu1 %v3991_v50  ;;  %v4117_v53 = vld [vmem:[%s6465_s5 + $0x13c] ss:$12 sps:$4 sm:$0xff]   ;;  %v4037_v50 = vld [vmem:[%s6463_s3 + $0x280] ss:$24 sps:$4 sm:$0xff]  }
 0x1dc   :  { %3642 = vmatprep.subr.msk.bf16.mxu0 %vm2029_vm12, %v3637_v19  ;;  %3644 = vmatprep.subr.msk.bf16.mxu1 %vm2029_vm12, %v3639_v34  ;;  %v4040_v19 = vld [vmem:[%s6463_s3 + $0x2b0] ss:$24 sps:$4 sm:$0xff]   ;;  %v4045_v34 = vld [vmem:[%s6463_s3 + $0x2e4] ss:$24 sps:$4 sm:$0xff]  }
 0x1df   :  { %2102 = vmatpush1.bf16.msra.mxu0 %v2031_v39  ;;  %2184 = vmatpush1.bf16.msra.mxu1 %v2037_v13  ;;  %v4043_v39 = vld [vmem:[%s6463_s3 + $0x2e0] ss:$24 sps:$4 sm:$0xff]   ;;  %v4048_v13 = vld [vmem:[%s6463_s3 + $0x314] ss:$24 sps:$4 sm:$0xff]  }
 0x1e0   :  { %2212 = vmatprep.subr.bf16.mxu0 %v4000_v16  ;;  %3227 = vmatprep.subr.bf16.mxu1 %v4068_v33  ;;  %v4046_v16 = vld [vmem:[%s6463_s3 + $0x310] ss:$24 sps:$4 sm:$0xff]   ;;  %v4051_v33 = vld [vmem:[%s6463_s3 + $0x344] ss:$24 sps:$4 sm:$0xff]  }
 0x1e2   :  { %3643 = vmatmul.mubr.msk.bf16.vlgmr.msra.gmra.mrb[0].mxu0 %vm858_vm4, %v5866_v52  ;;  %3645 = vmatmul.mubr.msk.bf16.vlgmr.msra.gmra.mrb[0].mxu1 %vm858_vm4, %v5866_v52 }
 0x1e3   :  { %2213 = vmatpush1.bf16.msra.mxu0 %v3998_v49  ;;  %2244 = vmatprep.mubr.bf16.mxu0 %v5760_v5  ;;  %v4084_v5 = vld [vmem:[%s6465_s5 + $0x90] ss:$12 sps:$4 sm:$0xff]   ;;  %v4049_v49 = vld [vmem:[%s6463_s3 + $0x340] ss:$24 sps:$4 sm:$0xff]  }
 0x1e4   :  { %2214 = vmatprep.subr.bf16.mxu0 %v4003_v57  ;;  %3228 = vmatpush1.bf16.msra.mxu1 %v4066_v45  ;;  %v4054_v57 = vld [vmem:[%s6463_s3 + $0x374] ss:$24 sps:$4 sm:$0xff]   ;;  %v4052_v45 = vld [vmem:[%s6463_s3 + $0x370] ss:$24 sps:$4 sm:$0xff]  }
 0x1e5   :  { %3229 = vmatprep.subr.bf16.mxu1 %v4071_v3  ;;  %v4055_v3 = vld [vmem:[%s6463_s3 + $0x3a0] ss:$24 sps:$4 sm:$0xff]  }
 0x1e7   :  { %2215 = vmatpush1.bf16.msra.mxu0 %v4001_v46  ;;  %v4060_v46 = vld [vmem:[%s6463_s3 + $0x3d4] ss:$24 sps:$4 sm:$0xff]  }
 0x1e8   :  { %2216 = vmatprep.subr.bf16.mxu0 %v4006_v2  ;;  %3230 = vmatpush1.bf16.msra.mxu1 %v4069_v11  ;;  %v4058_v2 = vld [vmem:[%s6463_s3 + $0x3d0] ss:$24 sps:$4 sm:$0xff]   ;;  %v4063_v11 = vld [vmem:[%s6463_s3 + $0x404] ss:$24 sps:$4 sm:$0xff]  }
 0x1e9   :  { %3231 = vmatprep.subr.bf16.mxu1 %v4074_v12  ;;  %v1237_v12 = vld [vmem:[%s6463_s3 + $0x430] sm:$0xff] }
 0x1eb   :  { %2217 = vmatpush1.bf16.msra.mxu0 %v4004_v58  ;;  %v4061_v58 = vld [vmem:[%s6463_s3 + $0x400] ss:$24 sps:$4 sm:$0xff]  }
 0x1ec   :  { %2218 = vmatprep.subr.bf16.mxu0 %v4009_v41  ;;  %3232 = vmatpush1.bf16.msra.mxu1 %v4072_v25  ;;  %v3641_v41 = vcombine.high %v1237_v12, %v1237_v12  ;;  %v3640_v25 = vcombine.low %v1237_v12, %v1237_v12  ;;  %v4147_v12 = vld [vmem:[%s6465_s5 + $0x1cc] ss:$12 sps:$4 sm:$0xff]  }
 0x1ed   :  { %3233 = vmatprep.subr.bf16.mxu1 %v4077_v28 }
 0x1ee   :  { %v2043_v28 = vsel %vm2029_vm12, %v3640_v25, 0  ;;  %v4149_v25 = vld [vmem:[%s6465_s5 + $0x1d0] ss:$12 sps:$4 sm:$0xff]  }
 0x1ef   :  { %2219 = vmatpush1.bf16.msra.mxu0 %v4007_v9  ;;  %v4093_v9 = vld [vmem:[%s6465_s5 + $0xc8] ss:$12 sps:$4 sm:$0xff]  }
 0x1f0   :  { %2220 = vmatprep.subr.bf16.mxu0 %v4012_v4  ;;  %3234 = vmatpush1.bf16.msra.mxu1 %v4075_v7  ;;  %v4120_v4 = vld [vmem:[%s6465_s5 + $0x150] ss:$12 sps:$4 sm:$0xff]   ;;  %v4122_v7 = vld [vmem:[%s6465_s5 + $0x154] ss:$12 sps:$4 sm:$0xff]  }
 0x1f1   :  { %3235 = vmatprep.subr.bf16.mxu1 %v4080_v61  ;;  %v4094_v61 = vld [vmem:[%s6465_s5 + $0x8] ss:$12 sps:$4 sm:$0xff]  }
 0x1f3   :  { %2221 = vmatpush1.bf16.msra.mxu0 %v4010_v32  ;;  %v4098_v32 = vld [vmem:[%s6465_s5 + $0xe0] ss:$12 sps:$4 sm:$0xff]  }
 0x1f4   :  { %2222 = vmatprep.subr.bf16.mxu0 %v4015_v29  ;;  %3236 = vmatpush1.bf16.msra.mxu1 %v4078_v31  ;;  %v4127_v29 = vld [vmem:[%s6465_s5 + $0x16c] ss:$12 sps:$4 sm:$0xff]   ;;  %v4125_v31 = vld [vmem:[%s6465_s5 + $0x168] ss:$12 sps:$4 sm:$0xff]  }
 0x1f5   :  { %3237 = vmatprep.subr.bf16.mxu1 %v4083_v36  ;;  %v4132_v36 = vld [vmem:[%s6465_s5 + $0x184] ss:$12 sps:$4 sm:$0xff]  }
 0x1f7   :  { %2223 = vmatpush1.bf16.msra.mxu0 %v4013_v47  ;;  %v4099_v47 = vld [vmem:[%s6465_s5 + $0x20] ss:$12 sps:$4 sm:$0xff]  }
 0x1f8   :  { %2224 = vmatprep.subr.bf16.mxu0 %v4018_v21  ;;  %3238 = vmatpush1.bf16.msra.mxu1 %v4081_v40  ;;  %v4103_v21 = vld [vmem:[%s6465_s5 + $0xf8] ss:$12 sps:$4 sm:$0xff]   ;;  %v4108_v40 = vld [vmem:[%s6465_s5 + $0x110] ss:$12 sps:$4 sm:$0xff]  }
 0x1f9   :  { %3239 = vmatprep.subr.bf16.mxu1 %v4086_v48  ;;  %v4109_v48 = vld [vmem:[%s6465_s5 + $0x50] ss:$12 sps:$4 sm:$0xff]  }
 0x1fb   :  { %2225 = vmatpush1.bf16.msra.mxu0 %v4016_v10  ;;  %v4113_v10 = vld [vmem:[%s6465_s5 + $0x128] ss:$12 sps:$4 sm:$0xff]  }
 0x1fc   :  { %2226 = vmatprep.subr.bf16.mxu0 %v4021_v42  ;;  %3240 = vmatpush1.bf16.msra.mxu1 %v4084_v5  ;;  %v4114_v42 = vld [vmem:[%s6465_s5 + $0x68] ss:$12 sps:$4 sm:$0xff]   ;;  %v4118_v5 = vld [vmem:[%s6465_s5 + $0x140] ss:$12 sps:$4 sm:$0xff]  }
 0x1fd   :  { %3241 = vmatprep.subr.bf16.mxu1 %v4089_v56  ;;  %v4119_v56 = vld [vmem:[%s6465_s5 + $0x80] ss:$12 sps:$4 sm:$0xff]  }
 0x1ff   :  { %2227 = vmatpush1.bf16.msra.mxu0 %v4019_v63  ;;  %v4123_v63 = vld [vmem:[%s6465_s5 + $0x158] ss:$12 sps:$4 sm:$0xff]  }
 0x200   :  { %2228 = vmatprep.subr.bf16.mxu0 %v4024_v24  ;;  %3242 = vmatpush1.bf16.msra.mxu1 %v4087_v0  ;;  %v4124_v24 = vld [vmem:[%s6465_s5 + $0x98] ss:$12 sps:$4 sm:$0xff]   ;;  %v4128_v0 = vld [vmem:[%s6465_s5 + $0x170] ss:$12 sps:$4 sm:$0xff]  }
 0x201   :  { %3243 = vmatprep.subr.bf16.mxu1 %v4092_v44  ;;  %v4129_v44 = vld [vmem:[%s6465_s5 + $0xb0] ss:$12 sps:$4 sm:$0xff]  }
 0x203   :  { %2229 = vmatpush1.bf16.msra.mxu0 %v4022_v6  ;;  %v4133_v6 = vld [vmem:[%s6465_s5 + $0x248] ss:$12 sps:$4 sm:$0xff]  }
 0x204   :  { %2230 = vmatprep.subr.bf16.mxu0 %v4027_v15  ;;  %3244 = vmatpush1.bf16.msra.mxu1 %v4090_v37  ;;  %v1240_v15 = vlaneseq }
 0x205   :  { %3245 = vmatprep.subr.bf16.mxu1 %v4097_v51 }
 0x206   :  { %v6146_v37 = vshrl.u32 %v1240_v15, 7 }
 0x207   :  { %2231 = vmatpush1.bf16.msra.mxu0 %v4025_v59  ;;  %v6152_v59 = vld [vmem:[%s6466_s4] sm:$0x3f] }
 0x208   :  { %2232 = vmatprep.subr.bf16.mxu0 %v4030_v60  ;;  %3246 = vmatpush1.bf16.msra.mxu1 %v4095_v35  ;;  %v1242_v51 = vsub.s32 0, %v6146_v37  ;;  %v1246_v60 = vsub.s32 1, %v6146_v37  ;;  %v1254_v35 = vsub.s32 3, %v6146_v37 }
 0x209   :  { %3247 = vmatprep.subr.bf16.mxu1 %v4102_v14 }
 0x20a   :  { %v1243_v14 = vrot.slane %v6152_v59, %v1242_v51 }
 0x20b   :  { %2233 = vmatpush1.bf16.msra.mxu0 %v4028_v22  ;;  %v1247_v22 = vrot.slane %v6152_v59, %v1246_v60 }
 0x20c   :  { %2234 = vmatprep.subr.bf16.mxu0 %v4033_v27  ;;  %3248 = vmatpush1.bf16.msra.mxu1 %v4100_v8  ;;  %v1255_v27 = vrot.slane %v6152_v59, %v1254_v35  ;;  %v4175_v35 = vld [vmem:[%s6465_s5 + $0x25c] ss:$12 sps:$4 sm:$0xff]  }
 0x20d   :  { %3249 = vmatprep.subr.bf16.mxu1 %v4107_v26 }
 0x20f   :  { %2235 = vmatpush1.bf16.msra.mxu0 %v4031_v23 }
 0x210   :  { %2236 = vmatprep.subr.bf16.mxu0 %v4036_v17  ;;  %3250 = vmatpush1.bf16.msra.mxu1 %v4105_v30 }
 0x211   :  { %3251 = vmatprep.subr.bf16.mxu1 %v4112_v62 }
 0x213   :  { %2237 = vmatpush1.bf16.msra.mxu0 %v4034_v54 }
 0x214   :  { %2238 = vmatprep.subr.bf16.mxu0 %v4039_v20  ;;  %3252 = vmatpush1.bf16.msra.mxu1 %v4110_v1 }
 0x215   :  { %3253 = vmatprep.subr.bf16.mxu1 %v4117_v53 }
 0x217   :  { %2239 = vmatpush1.bf16.msra.mxu0 %v4037_v50 }
 0x218   :  { %2240 = vmatprep.subr.bf16.mxu0 %v4042_v43  ;;  %3254 = vmatpush1.bf16.msra.mxu1 %v4115_v55 }
 0x219   :  { %3255 = vmatprep.subr.bf16.mxu1 %v4122_v7  ;;  %v4154_v7 = vld [vmem:[%s6465_s5 + $0x1e8] ss:$12 sps:$4 sm:$0xff]  }
 0x21b   :  { %2241 = vmatpush1.bf16.msra.mxu0 %v4040_v19 }
 0x21c   :  { %2242 = vmatprep.subr.bf16.mxu0 %v4045_v34  ;;  %3256 = vmatpush1.bf16.msra.mxu1 %v4120_v4  ;;  %v4150_v4 = vld [vmem:[%s6465_s5 + $0x1e0] ss:$12 sps:$4 sm:$0xff]  }
 0x21d   :  { %3257 = vmatprep.subr.bf16.mxu1 %v4127_v29  ;;  %v4158_v29 = vld [vmem:[%s6465_s5 + $0x2c0] ss:$12 sps:$4 sm:$0xff]  }
 0x21f   :  { %2243 = vmatpush1.bf16.msra.mxu0 %v4043_v39  ;;  %v4130_v39 = vld [vmem:[%s6465_s5 + $0x180] ss:$12 sps:$4 sm:$0xff]  }
 0x220   :  { %2253 = vmatprep.subr.bf16.mxu0 %v4048_v13  ;;  %3258 = vmatpush1.bf16.msra.mxu1 %v4125_v31  ;;  %v4134_v13 = vld [vmem:[%s6465_s5 + $0x188] ss:$12 sps:$4 sm:$0xff]   ;;  %v4155_v31 = vld [vmem:[%s6465_s5 + $0x1f8] ss:$12 sps:$4 sm:$0xff]  }
 0x221   :  { %3268 = vmatprep.subr.bf16.mxu1 %v4132_v36  ;;  %v4159_v36 = vld [vmem:[%s6465_s5 + $0x200] ss:$12 sps:$4 sm:$0xff]  }
 0x222   :  { %2245 = vmatmul.mubr.bf16.vlgmr.msra.gmra.mrb[4].mxu0 %v5773_v18  ;;  %v4057_v18 = vld [vmem:[%s6463_s3 + $0x3a4] ss:$24 sps:$4 sm:$0xff]  }
 0x223   :  { %2254 = vmatpush1.bf16.msra.mxu0 %v4046_v16  ;;  %2285 = vmatprep.mubr.bf16.mxu0 %v4292_v38 }
 0x224   :  { %2255 = vmatprep.subr.bf16.mxu0 %v4051_v33  ;;  %v4137_v33 = vld [vmem:[%s6465_s5 + $0x19c] ss:$12 sps:$4 sm:$0xff]  }
 0x227   :  { %2256 = vmatpush1.bf16.msra.mxu0 %v4049_v49  ;;  %v4138_v49 = vld [vmem:[%s6465_s5 + $0x260] ss:$12 sps:$4 sm:$0xff]  }
 0x228   :  { %2257 = vmatprep.subr.bf16.mxu0 %v4054_v57 }
 0x22b   :  { %2258 = vmatpush1.bf16.msra.mxu0 %v4052_v45  ;;  %v4135_v45 = vld [vmem:[%s6465_s5 + $0x198] ss:$12 sps:$4 sm:$0xff]  }
 0x22c   :  { %2259 = vmatprep.subr.bf16.mxu0 %v4057_v18  ;;  %v4139_v18 = vld [vmem:[%s6465_s5 + $0x1a0] ss:$12 sps:$4 sm:$0xff]  }
 0x22f   :  { %2260 = vmatpush1.bf16.msra.mxu0 %v4055_v3  ;;  %v4142_v3 = vld [vmem:[%s6465_s5 + $0x1b4] ss:$12 sps:$4 sm:$0xff]  }
 0x230   :  { %2261 = vmatprep.subr.bf16.mxu0 %v4060_v46  ;;  %v4143_v46 = vld [vmem:[%s6465_s5 + $0x278] ss:$12 sps:$4 sm:$0xff]  }
 0x233   :  { %2262 = vmatpush1.bf16.msra.mxu0 %v4058_v2  ;;  %v4140_v2 = vld [vmem:[%s6465_s5 + $0x1b0] ss:$12 sps:$4 sm:$0xff]  }
 0x234   :  { %2263 = vmatprep.subr.bf16.mxu0 %v4063_v11  ;;  %v4144_v11 = vld [vmem:[%s6465_s5 + $0x1b8] ss:$12 sps:$4 sm:$0xff]  }
 0x237   :  { %2264 = vmatpush1.bf16.msra.mxu0 %v4061_v58  ;;  %v4148_v58 = vld [vmem:[%s6465_s5 + $0x290] ss:$12 sps:$4 sm:$0xff]  }
 0x238   :  { %3646 = vmatprep.subr.msk.bf16.mxu0 %vm2029_vm12, %v3641_v41  ;;  %v4145_v41 = vld [vmem:[%s6465_s5 + $0x1c8] ss:$12 sps:$4 sm:$0xff]  }
 0x23b   :  { %2266 = vmatpush1.bf16.msra.mxu0 %v2043_v28  ;;  %v4152_v28 = vld [vmem:[%s6465_s5 + $0x1e4] ss:$12 sps:$4 sm:$0xff]  }
 0x23c   :  { %3785 = vmatprep.subr.bf16.mxu0 %v4093_v9  ;;  %v4153_v9 = vld [vmem:[%s6465_s5 + $0x2a8] ss:$12 sps:$4 sm:$0xff]  }
 0x23e   :  { %3647 = vmatmul.mubr.msk.bf16.vlgmr.msra.gmra.mrb[4].mxu0 %vm858_vm4, %v5866_v52  ;;  %v4104_v52 = vld [vmem:[%s6465_s5 + $0x38] ss:$12 sps:$4 sm:$0xff]  }
 0x23f   :  { %3786 = vmatpush3.bf16.msra.mxu0 %v4094_v61  ;;  %v1250_v61 = vsub.s32 2, %v6146_v37 }
 0x240   :  { %3787 = vmatprep.subr.bf16.mxu0 %v4098_v32  ;;  %v4157_v32 = vld [vmem:[%s6465_s5 + $0x1fc] ss:$12 sps:$4 sm:$0xff]  }
 0x243   :  { %3788 = vmatpush3.bf16.msra.mxu0 %v4099_v47  ;;  %v1251_v47 = vrot.slane %v6152_v59, %v1250_v61 }
 0x244   :  { %3789 = vmatprep.subr.bf16.mxu0 %v4103_v21  ;;  %v4162_v21 = vld [vmem:[%s6465_s5 + $0x214] ss:$12 sps:$4 sm:$0xff]  }
 0x247   :  { %3790 = vmatpush3.bf16.msra.mxu0 %v4104_v52  ;;  %v4163_v52 = vld [vmem:[%s6465_s5 + $0x2d8] ss:$12 sps:$4 sm:$0xff]  }
 0x248   :  { %3791 = vmatprep.subr.bf16.mxu0 %v4108_v40  ;;  %v4160_v40 = vld [vmem:[%s6465_s5 + $0x210] ss:$12 sps:$4 sm:$0xff]  }
 0x24b   :  { %3792 = vmatpush3.bf16.msra.mxu0 %v4109_v48  ;;  %v4164_v48 = vld [vmem:[%s6465_s5 + $0x218] ss:$12 sps:$4 sm:$0xff]  }
 0x24c   :  { %3793 = vmatprep.subr.bf16.mxu0 %v4113_v10 }
 0x24f   :  { %3794 = vmatpush3.bf16.msra.mxu0 %v4114_v42  ;;  %v4167_v42 = vld [vmem:[%s6465_s5 + $0x22c] ss:$12 sps:$4 sm:$0xff]  }
 0x250   :  { %3795 = vmatprep.subr.bf16.mxu0 %v4118_v5  ;;  %v4168_v5 = vld [vmem:[%s6465_s5 + $0x2f0] ss:$12 sps:$4 sm:$0xff]  }
 0x253   :  { %3796 = vmatpush3.bf16.msra.mxu0 %v4119_v56  ;;  %v4165_v56 = vld [vmem:[%s6465_s5 + $0x228] ss:$12 sps:$4 sm:$0xff]  }
 0x254   :  { %3797 = vmatprep.subr.bf16.mxu0 %v4123_v63  ;;  %v4169_v63 = vld [vmem:[%s6465_s5 + $0x230] ss:$12 sps:$4 sm:$0xff]  }
 0x257   :  { %3798 = vmatpush3.bf16.msra.mxu0 %v4124_v24 }
 0x258   :  { %3799 = vmatprep.subr.bf16.mxu0 %v4128_v0  ;;  %v4172_v0 = vld [vmem:[%s6465_s5 + $0x244] ss:$12 sps:$4 sm:$0xff]  }
 0x25b   :  { %3800 = vmatpush3.bf16.msra.mxu0 %v4129_v44  ;;  %v4170_v44 = vld [vmem:[%s6465_s5 + $0x240] ss:$12 sps:$4 sm:$0xff]  }
 0x25c   :  { %3807 = vmatprep.subr.bf16.mxu0 %v4133_v6  ;;  %v4179_v6 = vld [vmem:[%s6465_s5 + $0x308] ss:$12 sps:$4 sm:$0xff]  }
 0x2b5   :  { %v2123_v8 = vpop.f32.mrb[0].mxu0  ;;  %v6163_v26 = vpop.f32.mrb[0].mxu1 }
 0x2b6   :  { %v3829_v23 = vadd.f32 %v2123_v8, %v1243_v14  ;;  %v2125_v17 = vpop.f32.mrb[1].mxu0  ;;  %v2207_v30 = vpop.f32.mrb[1].mxu1  ;;  %v3831_v10 = vadd.f32 %v6163_v26, %v1251_v47  ;;  %v4173_v14 = vld [vmem:[%s6465_s5 + $0x258] ss:$12 sps:$4 sm:$0xff]   ;;  %v4176_v8 = vld [vmem:[%s6465_s5 + $0x270] ss:$12 sps:$4 sm:$0xff]  }
 0x2b7   :  { %v3830_v62 = vadd.f32 %v2125_v17, %v1247_v22  ;;  %v3832_v54 = vadd.f32 %v2207_v30, %v1255_v27  ;;  %v2127_v20 = vpop.f32.mrb[2].mxu0  ;;  %v2209_v1 = vpop.f32.mrb[2].mxu1  ;;  %v4183_v22 = vld [vmem:[%s6465_s5 + $0x320] ss:$12 sps:$4 sm:$0xff]   ;;  %v4187_v26 = vld [vmem:[%s6465_s5 + $0x338] ss:$12 sps:$4 sm:$0xff]  }
 0x2b8   :  { %v2294_v53 = vmax.f32 %v3829_v23, 0.0  ;;  %v2128_v50 = vpop.f32.mrb[3].mxu0  ;;  %v2210_v43 = vpop.f32.mrb[3].mxu1  ;;  %v2296_v24 = vmax.f32 %v3831_v10, 0.0  ;;  %v4178_v27 = vld [vmem:[%s6465_s5 + $0x274] ss:$12 sps:$4 sm:$0xff]  }
 0x2b9   :  { %v2295_v55 = vmax.f32 %v3830_v62, 0.0  ;;  %v2297_v19 = vmax.f32 %v3832_v54, 0.0  ;;  %v4182_v23 = vld [vmem:[%s6465_s5 + $0x28c] ss:$12 sps:$4 sm:$0xff]   ;;  %v4180_v17 = vld [vmem:[%s6465_s5 + $0x288] ss:$12 sps:$4 sm:$0xff]  }
 0x2ba   :  { %v2300_v16 = vpack.c.bf16 %v2294_v53, %v2294_v53  ;;  %v2302_v15 = vpack.c.bf16 %v2296_v24, %v2296_v24  ;;  %v4191_v30 = vld [vmem:[%s6465_s5 + $0x350] ss:$12 sps:$4 sm:$0xff]   ;;  %v4184_v54 = vld [vmem:[%s6465_s5 + $0x2a0] ss:$12 sps:$4 sm:$0xff]   ;;  %v4195_v20 = vld [vmem:[%s6465_s5 + $0x368] ss:$12 sps:$4 sm:$0xff]  }
 0x2bb   :  { %v2301_v34 = vpack.c.bf16 %v2295_v55, %v2295_v55  ;;  %v2303_v57 = vpack.c.bf16 %v2297_v19, %v2297_v19  ;;  %v4186_v62 = vld [vmem:[%s6465_s5 + $0x2a4] ss:$12 sps:$4 sm:$0xff]   ;;  %v4190_v1 = vld [vmem:[%s6465_s5 + $0x2bc] ss:$12 sps:$4 sm:$0xff]   ;;  %v4199_v50 = vld [vmem:[%s6465_s5 + $0x380] ss:$12 sps:$4 sm:$0xff]  }
 0x2bc   :  { %v4188_v53 = vld [vmem:[%s6465_s5 + $0x2b8] ss:$12 sps:$4 sm:$0xff]   ;;  %v4194_v43 = vld [vmem:[%s6465_s5 + $0x2d4] ss:$12 sps:$4 sm:$0xff]   ;;  %v4192_v55 = vld [vmem:[%s6465_s5 + $0x2d0] ss:$12 sps:$4 sm:$0xff]  }
 0x2bd   :  { %3259 = vmatprep.mubr.bf16.mxu1 %v2301_v34  ;;  %3382 = vmatprep.mubr.bf16.mxu0 %v2301_v34  ;;  %v4203_v19 = vld [vmem:[%s6465_s5 + $0x398] ss:$12 sps:$4 sm:$0xff]  }
 0x2be   :  { %3260 = vmatmul.mubr.bf16.vlgmr.msra.gmra.mrb[4].mxu1 %v2300_v16  ;;  %3383 = vmatmul.mubr.bf16.vlgmr.msra.gmra.mrb[8].mxu0 %v2300_v16  ;;  %v4198_v34 = vld [vmem:[%s6465_s5 + $0x2ec] ss:$12 sps:$4 sm:$0xff]   ;;  %v4202_v16 = vld [vmem:[%s6465_s5 + $0x304] ss:$12 sps:$4 sm:$0xff]  }
 0x2bf   :  { %3269 = vmatpush1.bf16.msra.mxu1 %v4130_v39  ;;  %3808 = vmatpush3.bf16.msra.mxu0 %v4134_v13  ;;  %v4196_v39 = vld [vmem:[%s6465_s5 + $0x2e8] ss:$12 sps:$4 sm:$0xff]   ;;  %v4207_v13 = vld [vmem:[%s6465_s5 + $0x3b0] ss:$12 sps:$4 sm:$0xff]  }
 0x2c0   :  { %3300 = vmatprep.mubr.bf16.mxu1 %v2303_v57  ;;  %3422 = vmatprep.mubr.bf16.mxu0 %v2303_v57  ;;  %v4206_v57 = vld [vmem:[%s6465_s5 + $0x31c] ss:$12 sps:$4 sm:$0xff]  }
 0x2c1   :  { %3270 = vmatprep.subr.bf16.mxu1 %v4137_v33  ;;  %3809 = vmatprep.subr.bf16.mxu0 %v4138_v49  ;;  %v4200_v33 = vld [vmem:[%s6465_s5 + $0x300] ss:$12 sps:$4 sm:$0xff]   ;;  %v4211_v49 = vld [vmem:[%s6465_s5 + $0x3c8] ss:$12 sps:$4 sm:$0xff]  }
 0x2c3   :  { %3271 = vmatpush1.bf16.msra.mxu1 %v4135_v45  ;;  %3810 = vmatpush3.bf16.msra.mxu0 %v4139_v18  ;;  %v4204_v45 = vld [vmem:[%s6465_s5 + $0x318] ss:$12 sps:$4 sm:$0xff]   ;;  %v4215_v18 = vld [vmem:[%s6465_s5 + $0x3e0] ss:$12 sps:$4 sm:$0xff]  }
 0x2c4   :  { %3272 = vmatprep.subr.bf16.mxu1 %v4142_v3  ;;  %3811 = vmatprep.subr.bf16.mxu0 %v4143_v46  ;;  %v4210_v3 = vld [vmem:[%s6465_s5 + $0x334] ss:$12 sps:$4 sm:$0xff]   ;;  %v4208_v46 = vld [vmem:[%s6465_s5 + $0x330] ss:$12 sps:$4 sm:$0xff]  }
 0x2c7   :  { %3273 = vmatpush1.bf16.msra.mxu1 %v4140_v2  ;;  %3812 = vmatpush3.bf16.msra.mxu0 %v4144_v11  ;;  %v4219_v2 = vld [vmem:[%s6465_s5 + $0x3f8] ss:$12 sps:$4 sm:$0xff]  }
 0x2c8   :  { %3274 = vmatprep.subr.bf16.mxu1 %v4147_v12  ;;  %3813 = vmatprep.subr.bf16.mxu0 %v4148_v58  ;;  %v4214_v11 = vld [vmem:[%s6465_s5 + $0x34c] ss:$12 sps:$4 sm:$0xff]   ;;  %v4212_v12 = vld [vmem:[%s6465_s5 + $0x348] ss:$12 sps:$4 sm:$0xff]   ;;  %v4223_v58 = vld [vmem:[%s6465_s5 + $0x410] ss:$12 sps:$4 sm:$0xff]  }
 0x2cb   :  { %3275 = vmatpush1.bf16.msra.mxu1 %v4145_v41  ;;  %3814 = vmatpush3.bf16.msra.mxu0 %v4149_v25  ;;  %v4218_v41 = vld [vmem:[%s6465_s5 + $0x364] ss:$12 sps:$4 sm:$0xff]   ;;  %v1258_v25 = vsub.s32 4, %v6146_v37 }
 0x2cc   :  { %3276 = vmatprep.subr.bf16.mxu1 %v4152_v28  ;;  %3815 = vmatprep.subr.bf16.mxu0 %v4153_v9  ;;  %v4216_v28 = vld [vmem:[%s6465_s5 + $0x360] ss:$12 sps:$4 sm:$0xff]   ;;  %v1262_v9 = vsub.s32 5, %v6146_v37 }
 0x2cf   :  { %3277 = vmatpush1.bf16.msra.mxu1 %v4150_v4  ;;  %3816 = vmatpush3.bf16.msra.mxu0 %v4154_v7  ;;  %v4227_v4 = vld [vmem:[%s6465_s5 + $0x428] ss:$12 sps:$4 sm:$0xff]  }
 0x2d0   :  { %3278 = vmatprep.subr.bf16.mxu1 %v4157_v32  ;;  %3817 = vmatprep.subr.bf16.mxu0 %v4158_v29  ;;  %v4222_v7 = vld [vmem:[%s6465_s5 + $0x37c] ss:$12 sps:$4 sm:$0xff]   ;;  %v1259_v32 = vrot.slane %v6152_v59, %v1258_v25  ;;  %v4220_v29 = vld [vmem:[%s6465_s5 + $0x378] ss:$12 sps:$4 sm:$0xff]  }
 0x2d3   :  { %3279 = vmatpush1.bf16.msra.mxu1 %v4155_v31  ;;  %3818 = vmatpush3.bf16.msra.mxu0 %v4159_v36  ;;  %v1263_v31 = vrot.slane %v6152_v59, %v1262_v9  ;;  %v4226_v36 = vld [vmem:[%s6465_s5 + $0x394] ss:$12 sps:$4 sm:$0xff]   ;;  %v4230_v59 = vld [vmem:[%s6465_s5 + $0x3ac] ss:$12 sps:$4 sm:$0xff]  }
 0x2d4   :  { %3280 = vmatprep.subr.bf16.mxu1 %v4162_v21  ;;  %3819 = vmatprep.subr.bf16.mxu0 %v4163_v52 }
 0x2d7   :  { %3281 = vmatpush1.bf16.msra.mxu1 %v4160_v40  ;;  %3820 = vmatpush3.bf16.msra.mxu0 %v4164_v48  ;;  %v4224_v48 = vld [vmem:[%s6465_s5 + $0x390] ss:$12 sps:$4 sm:$0xff]  }
 0x2d8   :  { %3282 = vmatprep.subr.bf16.mxu1 %v4167_v42  ;;  %3821 = vmatprep.subr.bf16.mxu0 %v4168_v5 }
 0x2db   :  { %3283 = vmatpush1.bf16.msra.mxu1 %v4165_v56  ;;  %3822 = vmatpush3.bf16.msra.mxu0 %v4169_v63  ;;  %v4228_v63 = vld [vmem:[%s6465_s5 + $0x3a8] ss:$12 sps:$4 sm:$0xff]  }
 0x2dc   :  { %3284 = vmatprep.subr.bf16.mxu1 %v4172_v0  ;;  %3430 = vmatprep.subr.bf16.mxu0 %v4292_v38  ;;  %v4233_v0 = vld [vmem:[%s6465_s5 + $0x3c4] ss:$12 sps:$4 sm:$0xff]  }
 0x2de   :  { %3423 = vmatmul.mubr.bf16.vlgmr.msra.gmra.mrb[12].mxu0 %v2302_v15 }
 0x2df   :  { %3285 = vmatpush1.bf16.msra.mxu1 %v4170_v44  ;;  %3431 = vmatpush1.bf16.msra.mxu0 %v4179_v6  ;;  %v4231_v44 = vld [vmem:[%s6465_s5 + $0x3c0] ss:$12 sps:$4 sm:$0xff]   ;;  %v4236_v6 = vld [vmem:[%s6465_s5 + $0x3dc] ss:$12 sps:$4 sm:$0xff]  }
 0x2e0   :  { %3286 = vmatprep.subr.bf16.mxu1 %v4175_v35  ;;  %3432 = vmatprep.subr.bf16.mxu0 %v4292_v38  ;;  %v4239_v35 = vld [vmem:[%s6465_s5 + $0x3f4] ss:$12 sps:$4 sm:$0xff]  }
 0x2e3   :  { %3287 = vmatpush1.bf16.msra.mxu1 %v4173_v14  ;;  %3433 = vmatpush1.bf16.msra.mxu0 %v4183_v22  ;;  %v4237_v14 = vld [vmem:[%s6465_s5 + $0x3f0] ss:$12 sps:$4 sm:$0xff]   ;;  %v4242_v22 = vld [vmem:[%s6465_s5 + $0x40c] ss:$12 sps:$4 sm:$0xff]  }
 0x2e4   :  { %3288 = vmatprep.subr.bf16.mxu1 %v4178_v27  ;;  %3434 = vmatprep.subr.bf16.mxu0 %v4292_v38  ;;  %v4240_v27 = vld [vmem:[%s6465_s5 + $0x408] ss:$12 sps:$4 sm:$0xff]  }
 0x2e7   :  { %3289 = vmatpush1.bf16.msra.mxu1 %v4176_v8  ;;  %3435 = vmatpush1.bf16.msra.mxu0 %v4187_v26  ;;  %v4245_v8 = vld [vmem:[%s6465_s5 + $0x424] ss:$12 sps:$4 sm:$0xff]   ;;  %v4243_v26 = vld [vmem:[%s6465_s5 + $0x420] ss:$12 sps:$4 sm:$0xff]  }
 0x2e8   :  { %3290 = vmatprep.subr.bf16.mxu1 %v4182_v23  ;;  %3436 = vmatprep.subr.bf16.mxu0 %v4292_v38 }
 0x2eb   :  { %3291 = vmatpush1.bf16.msra.mxu1 %v4180_v17  ;;  %3437 = vmatpush1.bf16.msra.mxu0 %v4191_v30 }
 0x2ec   :  { %3292 = vmatprep.subr.bf16.mxu1 %v4186_v62  ;;  %3438 = vmatprep.subr.bf16.mxu0 %v4292_v38 }
 0x2ef   :  { %3293 = vmatpush1.bf16.msra.mxu1 %v4184_v54  ;;  %3439 = vmatpush1.bf16.msra.mxu0 %v4195_v20  ;;  %v2486_v20 = vld [vmem:[%s6467_s6] sm:$0x7] }
 0x2f0   :  { %3294 = vmatprep.subr.bf16.mxu1 %v4190_v1  ;;  %3440 = vmatprep.subr.bf16.mxu0 %v4292_v38  ;;  %v2499_v1 = vrot.slane %v2486_v20, %v1250_v61  ;;  %v2491_v61 = vrot.slane %v2486_v20, %v1242_v51 }
 0x2f3   :  { %3295 = vmatpush1.bf16.msra.mxu1 %v4188_v53  ;;  %3441 = vmatpush1.bf16.msra.mxu0 %v4199_v50 }
 0x2f4   :  { %3296 = vmatprep.subr.bf16.mxu1 %v4194_v43  ;;  %3442 = vmatprep.subr.bf16.mxu0 %v4292_v38 }
 0x2f7   :  { %3297 = vmatpush1.bf16.msra.mxu1 %v4192_v55  ;;  %3443 = vmatpush1.bf16.msra.mxu0 %v4203_v19 }
 0x2f8   :  { %3298 = vmatprep.subr.bf16.mxu1 %v4198_v34  ;;  %3444 = vmatprep.subr.bf16.mxu0 %v4292_v38 }
 0x2fb   :  { %3299 = vmatpush1.bf16.msra.mxu1 %v4196_v39  ;;  %3445 = vmatpush1.bf16.msra.mxu0 %v4207_v13 }
 0x2fc   :  { %3309 = vmatprep.subr.bf16.mxu1 %v4202_v16  ;;  %3446 = vmatprep.subr.bf16.mxu0 %v4292_v38 }
 0x2fe   :  { %3301 = vmatmul.mubr.bf16.vlgmr.msra.gmra.mrb[4].mxu1 %v2302_v15  ;;  %v4234_v15 = vld [vmem:[%s6465_s5 + $0x3d8] ss:$12 sps:$4 sm:$0xff]  }
 0x2ff   :  { %3310 = vmatpush1.bf16.msra.mxu1 %v4200_v33  ;;  %3447 = vmatpush1.bf16.msra.mxu0 %v4211_v49 }
 0x300   :  { %3311 = vmatprep.subr.bf16.mxu1 %v4206_v57  ;;  %3448 = vmatprep.subr.bf16.mxu0 %v4292_v38 }
 0x303   :  { %3312 = vmatpush1.bf16.msra.mxu1 %v4204_v45  ;;  %3449 = vmatpush1.bf16.msra.mxu0 %v4215_v18 }
 0x304   :  { %3313 = vmatprep.subr.bf16.mxu1 %v4210_v3  ;;  %3450 = vmatprep.subr.bf16.mxu0 %v4292_v38 }
 0x307   :  { %3314 = vmatpush1.bf16.msra.mxu1 %v4208_v46  ;;  %3451 = vmatpush1.bf16.msra.mxu0 %v4219_v2  ;;  %v2495_v2 = vrot.slane %v2486_v20, %v1246_v60 }
 0x308   :  { %3315 = vmatprep.subr.bf16.mxu1 %v4214_v11  ;;  %3452 = vmatprep.subr.bf16.mxu0 %v4292_v38 }
 0x30b   :  { %3316 = vmatpush1.bf16.msra.mxu1 %v4212_v12  ;;  %3453 = vmatpush1.bf16.msra.mxu0 %v4223_v58 }
 0x30c   :  { %3317 = vmatprep.subr.bf16.mxu1 %v4218_v41  ;;  %3454 = vmatprep.subr.bf16.mxu0 %v4292_v38 }
 0x30f   :  { %3318 = vmatpush1.bf16.msra.mxu1 %v4216_v28  ;;  %3455 = vmatpush1.bf16.msra.mxu0 %v4227_v4 }
 0x310   :  { %3319 = vmatprep.subr.bf16.mxu1 %v4222_v7 }
 0x311   :  { %v2287_v47 = vpop.f32.mrb[4].mxu0 }
 0x312   :  { %v3833_v21 = vadd.f32 %v2287_v47, %v1259_v32  ;;  %v2289_v52 = vpop.f32.mrb[5].mxu0 }
 0x313   :  { %v3834_v40 = vadd.f32 %v2289_v52, %v1263_v31  ;;  %3320 = vmatpush1.bf16.msra.mxu1 %v4220_v29  ;;  %v2291_v38 = vpop.f32.mrb[6].mxu0 }
 0x314   :  { %v2298_v10 = vmax.f32 %v3833_v21, 0.0  ;;  %v2292_v42 = vpop.f32.mrb[7].mxu0  ;;  %3321 = vmatprep.subr.bf16.mxu1 %v4226_v36 }
 0x315   :  { %v2299_v5 = vmax.f32 %v3834_v40, 0.0 }
 0x316   :  { %v2304_v24 = vpack.c.bf16 %v2298_v10, %v2298_v10 }
 0x317   :  { %v2305_v56 = vpack.c.bf16 %v2299_v5, %v2299_v5  ;;  %3322 = vmatpush1.bf16.msra.mxu1 %v4224_v48 }
 0x318   :  { %3323 = vmatprep.subr.bf16.mxu1 %v4230_v59 }
 0x319   :  { %3783 = vmatprep.mubr.msk.bf16.mxu1 %vm3223_vm13, %v2305_v56  ;;  %3784 = vmatprep.mubr.msk.bf16.mxu0 %vm3223_vm13, %v2305_v56 }
 0x31a   :  { %3463 = vmatmul.mubr.bf16.vlgmr.msra.gmra.mrb[16].mxu0 %v2304_v24 }
 0x31b   :  { %3324 = vmatpush1.bf16.msra.mxu1 %v4228_v63 }
 0x31c   :  { %3325 = vmatprep.subr.bf16.mxu1 %v4233_v0 }
 0x31f   :  { %3326 = vmatpush1.bf16.msra.mxu1 %v4231_v44 }
 0x320   :  { %3327 = vmatprep.subr.bf16.mxu1 %v4236_v6 }
 0x323   :  { %3328 = vmatpush1.bf16.msra.mxu1 %v4234_v15 }
 0x324   :  { %3329 = vmatprep.subr.bf16.mxu1 %v4239_v35 }
 0x327   :  { %3330 = vmatpush1.bf16.msra.mxu1 %v4237_v14 }
 0x328   :  { %3331 = vmatprep.subr.bf16.mxu1 %v4242_v22 }
 0x32b   :  { %3332 = vmatpush1.bf16.msra.mxu1 %v4240_v27 }
 0x32c   :  { %3333 = vmatprep.subr.bf16.mxu1 %v4245_v8 }
 0x32f   :  { %3334 = vmatpush1.bf16.msra.mxu1 %v4243_v26 }
 0x332   :  { %3342 = vmatmul.mubr.bf16.vlgmr.msra.gmra.mrb[4].mxu1 %v2304_v24 }
 0x391   :  { %v3801_v23 = vpop.f32.mrb[8].mxu0 }
 0x392   :  { %v3802_v17 = vpop.f32.mrb[9].mxu0 }
 0x393   :  { %v3803_v30 = vadd.f32 %v3802_v17, %v3801_v23  ;;  %v3804_v62 = vpop.f32.mrb[10].mxu0 }
 0x394   :  { %v3805_v54 = vpop.f32.mrb[11].mxu0 }
 0x395   :  { %v3385_v43 = vadd.f32 %v3803_v30, %v2499_v1 }
 0x3b1   :  { %v3823_v53 = vpop.f32.mrb[12].mxu0 }
 0x3b2   :  { %v3824_v50 = vpop.f32.mrb[13].mxu0 }
 0x3b3   :  { %v3825_v55 = vadd.f32 %v3824_v50, %v3823_v53  ;;  %v3826_v19 = vpop.f32.mrb[14].mxu0 }
 0x3b4   :  { %v3827_v34 = vpop.f32.mrb[15].mxu0 }
 0x3b5   :  { %v3425_v39 = vadd.f32 %v3825_v55, %v3385_v43 }
 0x3ed   :  { %v3464_v13 = vpop.f32.mrb[16].mxu0 }
 0x3ee   :  { %v3465_v16 = vadd.f32 %v3464_v13, %v3425_v39  ;;  %v3466_v33 = vpop.f32.mrb[17].mxu0 }
 0x3ef   :  { %v3467_v49 = vpop.f32.mrb[18].mxu0 }
 0x3f0   :  { %v3472_v57 = vsub.f32 0.0, %v3465_v16  ;;  %v3468_v45 = vpop.f32.mrb[19].mxu0 }
 0x3f2   :  { %v3477_v18 = vmul.f32 1.442695, %v3472_v57 }
 0x3f4   :  { %4246 = vpow2.f32 %v3477_v18 }
 0x3fe   :  { %v4247_v3 = vpop.eup %4246 }
 0x3ff   :  { %v3481_v46 = vadd.f32 1.0, %v4247_v3 }
 0x401   :  { %4248 = vrcp.f32 %v3481_v46 }
 0x405   :  { %v3343_v11 = vpop.f32.mrb[4].mxu1 }
 0x406   :  { %v3835_v12 = vadd.f32 %v3343_v11, %v2491_v61  ;;  %v3345_v58 = vpop.f32.mrb[5].mxu1 }
 0x407   :  { %v3836_v41 = vadd.f32 %v3345_v58, %v2495_v2  ;;  %v3347_v25 = vpop.f32.mrb[6].mxu1 }
 0x408   :  { %v3470_v28 = vsub.f32 0.0, %v3835_v12  ;;  %v3348_v9 = vpop.f32.mrb[7].mxu1 }
 0x409   :  { %v3471_v4 = vsub.f32 0.0, %v3836_v41 }
 0x40a   :  { %v3473_v7 = vmul.f32 1.442695, %v3470_v28 }
 0x40b   :  { %v4249_v32 = vpop.eup %4248  ;;  %v3475_v29 = vmul.f32 1.442695, %v3471_v4 }
 0x40c   :  { %4250 = vpow2.f32 %v3473_v7  ;;  %3487 = vst.msk [vmem:[%s6468_s7 + $0x10] sm:$0xff] %vm858_vm4, %v4249_v32 }
 0x40d   :  { %4252 = vpow2.f32 %v3475_v29 }
 0x416   :  { %v4251_v37 = vpop.eup %4250 }
 0x417   :  { %v4253_v51 = vpop.eup %4252  ;;  %v3479_v60 = vadd.f32 1.0, %v4251_v37 }
 0x418   :  { %v3480_v31 = vadd.f32 1.0, %v4253_v51 }
 0x419   :  { %4254 = vrcp.f32 %v3479_v60 }
 0x41a   :  { %4256 = vrcp.f32 %v3480_v31 }
 0x423   :  { %v4255_v36 = vpop.eup %4254 }
 0x424   :  { %v4257_v47 = vpop.eup %4256  ;;  %3485 = vst [vmem:[%s6468_s7] sm:$0xff] %v4255_v36 }
 0x425   :  { %3486 = vst [vmem:[%s6468_s7 + $0x8] sm:$0xff] %v4257_v47 }

</bundles_post_ra>
